<compile_context>
chip_gen: v6e
topology: v6e:2x2x1
jax: 0.10.0
libtpu: 0.0.40
codegen_flags: <defaults>
</compile_context>

<pallas_src>
import functools

import jax
import jax.numpy as jnp
from jax import lax
from jax.experimental import pallas as pl
from jax.experimental.pallas import tpu as pltpu


# ----------------------------------------------------------------------------- helpers
def _round_up(x, m):
    return ((x + m - 1) // m) * m


def _pad_axis(a, axis, target):
    if a.shape[axis] == target:
        return a
    widths = [(0, 0)] * a.ndim
    widths[axis] = (0, target - a.shape[axis])
    return jnp.pad(a, widths)


def _pad_gate_cols(a, hidden, hidden_p):
    """Pad a (..., 3*hidden) array to (..., 3*hidden_p), padding each r/z/n chunk
    separately so gate offsets land at 0, hidden_p, 2*hidden_p."""
    if hidden == hidden_p:
        return a
    r, z, n = jnp.split(a, 3, axis=-1)
    return jnp.concatenate(
        [_pad_axis(c, a.ndim - 1, hidden_p) for c in (r, z, n)], axis=-1)


def _pick_tile(dim, max_tile):
    """Largest multiple of 128 that divides `dim` (itself a multiple of 128)."""
    t = max(min(max_tile, dim) - (min(max_tile, dim) % 128), 128)
    while dim % t:
        t -= 128
    return t


def _pick_batch_block(bp, row_align, max_bb=256):
    """Largest row_align-multiple batch block dividing bp (capped at max_bb);
    halves it when that still leaves >=64-row blocks so v7x's 2nd core gets work."""
    max_bb = max(max_bb, row_align)
    best, cand = row_align, row_align
    while cand <= min(bp, max_bb):
        if bp % cand == 0:
            best = cand
        cand += row_align
    if best == bp and bp // 2 >= 64 and (bp // 2) % row_align == 0:
        best = bp // 2          # keep >=2 parallel grid iterations for megacore
    return best


def _sigmoid(x):
    # tanh form keeps the transcendental on the EUP (no VALU divide), so it
    # co-issues with the next step's MXU pushes.
    return 0.5 * (jnp.tanh(0.5 * x) + 1.0)


# ----------------------------------------------------------------- tiled matmul + bias
def _matmul_bias_kernel(x_ref, w_ref, b_ref, o_ref, acc_ref):
    @pl.when(pl.program_id(2) == 0)
    def _():
        acc_ref[...] = jnp.zeros_like(acc_ref)

    acc_ref[...] += jnp.dot(x_ref[...], w_ref[...],
                            preferred_element_type=jnp.float32)

    @pl.when(pl.program_id(2) == pl.num_programs(2) - 1)
    def _():
        o_ref[...] = (acc_ref[...] + b_ref[...]).astype(o_ref.dtype)


def _matmul_bias(x, w, b, *, out_dtype, row_align=8, tm=512, tn=512, tk=512):
    """(M, K) @ (K, N) + b -> (M, N); f32 accumulation; pads to aligned tiles."""
    M, K = x.shape
    Kw, N = w.shape
    assert K == Kw and b.shape == (N,)
    Kp = _round_up(K, 128)
    Np = _round_up(N, 128)
    tk = _pick_tile(Kp, tk)
    tn = _pick_tile(Np, tn)
    tm = min(tm, _round_up(M, row_align))
    Mp = _round_up(M, tm)

    xp = _pad_axis(_pad_axis(x, 0, Mp), 1, Kp)
    wp = _pad_axis(_pad_axis(w, 0, Kp), 1, Np)
    bp = _pad_axis(b.reshape(1, N), 1, Np).astype(jnp.float32)

    xb = jnp.dtype(x.dtype).itemsize
    wb = jnp.dtype(w.dtype).itemsize
    ob = jnp.dtype(out_dtype).itemsize
    vmem = (2 * tm * tk * xb + 2 * tk * tn * wb + 2 * tm * tn * ob
            + tm * tn * 4 + 2 * tn * 4)
    cost = pl.CostEstimate(
        flops=int(2 * Mp * Kp * Np),
        transcendentals=0,
        bytes_accessed=int(Mp * Kp * xb + Kp * Np * wb + Mp * Np * ob + Np * 4))

    out = pl.pallas_call(
        _matmul_bias_kernel,
        out_shape=jax.ShapeDtypeStruct((Mp, Np), out_dtype),
        grid=(Mp // tm, Np // tn, Kp // tk),
        in_specs=[
            pl.BlockSpec((tm, tk), lambda i, j, k: (i, k)),
            pl.BlockSpec((tk, tn), lambda i, j, k: (k, j)),
            pl.BlockSpec((1, tn), lambda i, j, k: (0, j)),
        ],
        out_specs=pl.BlockSpec((tm, tn), lambda i, j, k: (i, j)),
        scratch_shapes=[pltpu.VMEM((tm, tn), jnp.float32)],
        compiler_params=pltpu.CompilerParams(
            dimension_semantics=("parallel", "parallel", "arbitrary"),
            vmem_limit_bytes=max(int(vmem * 1.5) + (2 << 20), 24 << 20)),
        cost_estimate=cost,
    )(xp, wp, bp)
    return out[:M, :N]


# ------------------------------------------------------------------ serial GRU recurrence
def _gru_recurrence_kernel(gx_ref, wh_ref, h_out_ref, h_carry_ref):
    """One time chunk of the GRU recurrence for one batch block.

    gx_ref:      (tt, bb, 3*Hp)  precomputed x2h(x_t) + bias (per-gate padded)
    wh_ref:      (Hp, 3*Hp)      h2h weight, transposed + padded (grid-invariant)
    h_out_ref:   (tt, bb, Hp)    hidden state at every timestep of the chunk
    h_carry_ref: (bb, Hp) f32    hidden state carried across time chunks (scratch)
    """
    tt, bb, _ = gx_ref.shape
    Hp = h_out_ref.shape[-1]

    @pl.when(pl.program_id(1) == 0)          # first time chunk of this batch block
    def _():
        h_carry_ref[...] = jnp.zeros_like(h_carry_ref)

    wh = wh_ref[...]                          # resident across the whole chunk

    def cell(h, gx):
        gh = jnp.dot(h.astype(wh.dtype), wh,
                     preferred_element_type=jnp.float32)        # (rows, 3Hp)
        # TODO(synk): customFunctions.ApproxSigmoid/ApproxTanh are LUT-style
        # approximations with unknown tables; exact EUP sigmoid/tanh used instead.
        r = _sigmoid(gx[:, 0 * Hp:1 * Hp] + gh[:, 0 * Hp:1 * Hp])
        z = _sigmoid(gx[:, 1 * Hp:2 * Hp] + gh[:, 1 * Hp:2 * Hp])
        n = jnp.tanh(gx[:, 2 * Hp:3 * Hp] + r * gh[:, 2 * Hp:3 * Hp])
        return n + z * (h - n)

    unroll = min(8, tt)                       # bounded unroll: LLO visibility
    split = bb >= 16 and bb % 16 == 0         # two independent halves -> MXU/EUP overlap
    if split:
        half = bb // 2

        def step(t, carry):
            h_a, h_b = carry
            gx = gx_ref[t].astype(jnp.float32)
            hy_a = cell(h_a, gx[:half])
            hy_b = cell(h_b, gx[half:])
            h_out_ref[t] = jnp.concatenate([hy_a, hy_b], axis=0).astype(h_out_ref.dtype)
            return (hy_a, hy_b)

        init = (h_carry_ref[:half, :], h_carry_ref[half:, :])
        ha, hb = lax.fori_loop(0, tt, step, init, unroll=unroll)
        h_carry_ref[...] = jnp.concatenate([ha, hb], axis=0)
    else:
        def step(t, h):
            gx = gx_ref[t].astype(jnp.float32)
            hy = cell(h, gx)
            h_out_ref[t] = hy.astype(h_out_ref.dtype)
            return hy

        h_carry_ref[...] = lax.fori_loop(0, tt, step, h_carry_ref[...], unroll=unroll)


def _gru_recurrence(gate_x, wh_p, *, out_dtype, bb, tt):
    """gate_x: (Sp, Bp, 3*Hp), wh_p: (Hp, 3*Hp) -> hidden states (Sp, Bp, Hp)."""
    Sp, Bp, G3 = gate_x.shape
    Hp = wh_p.shape[0]
    gxb = jnp.dtype(gate_x.dtype).itemsize
    hb = jnp.dtype(out_dtype).itemsize
    whb = jnp.dtype(wh_p.dtype).itemsize

    # TODO(synk): on v7x the invariant wh block could be single-buffered via
    # pipeline_mode=pl.Buffered(1); the double-buffered copy is budgeted below instead.
    vmem = (2 * tt * bb * 3 * Hp * gxb + 2 * tt * bb * Hp * hb
            + 2 * Hp * 3 * Hp * whb + bb * Hp * 4)
    cost = pl.CostEstimate(
        flops=int(2 * Sp * Bp * Hp * 3 * Hp + 12 * Sp * Bp * Hp),
        transcendentals=int(3 * Sp * Bp * Hp),
        bytes_accessed=int(Sp * Bp * 3 * Hp * gxb + Sp * Bp * Hp * hb
                           + Hp * 3 * Hp * whb))

    return pl.pallas_call(
        _gru_recurrence_kernel,
        out_shape=jax.ShapeDtypeStruct((Sp, Bp, Hp), out_dtype),
        grid=(Bp // bb, Sp // tt),
        in_specs=[
            pl.BlockSpec((tt, bb, G3), lambda b, t: (t, b, 0)),
            pl.BlockSpec((Hp, G3), lambda b, t: (0, 0)),
        ],
        out_specs=pl.BlockSpec((tt, bb, Hp), lambda b, t: (t, b, 0)),
        scratch_shapes=[pltpu.VMEM((bb, Hp), jnp.float32)],
        compiler_params=pltpu.CompilerParams(
            # batch blocks independent -> megacore-shardable on v7x; time chunks
            # stay serial (carried hidden state in scratch).
            dimension_semantics=("parallel", "arbitrary"),
            vmem_limit_bytes=max(int(vmem * 1.25) + (2 << 20), 32 << 20)),
        cost_estimate=cost,
    )(gate_x, wh_p)


# ----------------------------------------------------------------------- weight prep
def prepare_params(params, compute_dtype=jnp.float32):
    """One-time (outside jit) transpose / gate-pad / lane-pad of all weights."""
    emb = params["emb_weight"].astype(jnp.float32)          # (V, E)
    wx = params["x2h_weight"].astype(jnp.float32)           # (3H, E)
    wh = params["h2h_weight"].astype(jnp.float32)           # (3H, H)
    bias = params["gru_bias"].astype(jnp.float32)           # (3H,)
    fcw = params["fc_weight"].astype(jnp.float32)           # (V, H)
    fcb = params["fc_bias"].astype(jnp.float32)             # (V,)

    V, E = emb.shape
    H = wh.shape[1]
    Hp = _round_up(H, 128)
    Ep = _round_up(E, 128)
    Vp = _round_up(V, 128)
    cd = compute_dtype
    return {
        "emb": _pad_axis(emb, 1, Ep),                                       # (V, Ep)  f32
        "wx_p": _pad_axis(_pad_gate_cols(wx.T, H, Hp), 0, Ep).astype(cd),   # (Ep, 3Hp)
        "wh_p": _pad_axis(_pad_gate_cols(wh.T, H, Hp), 0, Hp).astype(cd),   # (Hp, 3Hp)
        "bias_p": _pad_gate_cols(bias, H, Hp),                              # (3Hp,)   f32
        "fcw_p": _pad_axis(_pad_axis(fcw.T, 0, Hp), 1, Vp).astype(cd),      # (Hp, Vp)
        "fcb_p": _pad_axis(fcb, 0, Vp),                                     # (Vp,)    f32
    }


# ----------------------------------------------------------------------------- forward
def gru_model_forward(sequence, prepared, *,
                      recurrence_time_budget_bytes=16 << 20,
                      max_batch_block=256):
    """sequence: (batch, seq) int32 token ids -> logits (batch, seq, ntokens)."""
    emb, wx_p, wh_p = prepared["emb"], prepared["wx_p"], prepared["wh_p"]
    bias_p, fcw_p, fcb_p = prepared["bias_p"], prepared["fcw_p"], prepared["fcb_p"]

    V, Ep = emb.shape
    Hp = wh_p.shape[0]
    cd = wx_p.dtype
    itemsize = jnp.dtype(cd).itemsize
    row_align = 16 if cd == jnp.bfloat16 else 8   # sublane granularity per dtype

    B, S = sequence.shape
    Bp = _round_up(B, row_align)

    # Embedding lookup straight into time-major (S, B, Ep), with the
    # nn.Embedding(max_norm=2) renormalisation applied to the gathered rows.
    # TODO(synk): the data-dependent row gather stays in XLA.
    embeds = emb[sequence.T]                                         # (S, B, Ep)
    norms = jnp.sqrt(jnp.sum(embeds * embeds, axis=-1, keepdims=True))
    embeds = embeds * jnp.minimum(1.0, 2.0 / jnp.maximum(norms, 1e-7))
    embeds = _pad_axis(embeds, 1, Bp).astype(cd)                     # (S, Bp, Ep)

    # Hoisted input projection: one big matmul for all timesteps (+ bias folded in).
    gate_x = _matmul_bias(embeds.reshape(S * Bp, Ep), wx_p, bias_p,
                          out_dtype=cd, row_align=row_align)         # (S*Bp, 3Hp)
    gate_x = gate_x.reshape(S, Bp, 3 * Hp)

    # Time-chunk the serial recurrence: chunk sized from a VMEM byte budget so the
    # double-buffered (gate_x in + h out) blocks stay small on every generation.
    bb = _pick_batch_block(Bp, row_align, max_bb=max_batch_block)
    per_t = 2 * bb * (3 * Hp + Hp) * itemsize        # double-buffered bytes / timestep
    tt = int(max(1, min(S, recurrence_time_budget_bytes // per_t)))
    Sp = _round_up(S, tt)
    gate_x = _pad_axis(gate_x, 0, Sp)                                # (Sp, Bp, 3Hp)

    h_all = _gru_recurrence(gate_x, wh_p, out_dtype=cd, bb=bb, tt=tt)  # (Sp, Bp, Hp)

    # Hoisted fc projection over all (batch, time) rows.  Only the SMALL hidden
    # tensor is transposed so logits come out directly as (B, S, V).
    # TODO(synk): this transpose could be folded into the fc matmul's BlockSpec
    # index_map to save one S*B*Hp HBM round trip.
    h_bt = jnp.transpose(h_all[:S, :B, :], (1, 0, 2)).reshape(B * S, Hp)
    logits = _matmul_bias(h_bt, fcw_p, fcb_p,
                          out_dtype=jnp.float32, row_align=row_align)  # (B*S, Vp)
    return logits.reshape(B, S, -1)[:, :, :V]


# --------------------------------------------------------------------------- reference
def _reference_forward(sequence, params):
    """Pure-JAX reference mirroring the PyTorch forward."""
    emb_table = params["emb_weight"]
    wx, wh = params["x2h_weight"], params["h2h_weight"]
    bias, fcw, fcb = params["gru_bias"], params["fc_weight"], params["fc_bias"]
    B, S = sequence.shape
    H = wh.shape[1]

    embeds = emb_table[sequence]
    norms = jnp.sqrt(jnp.sum(embeds * embeds, axis=-1, keepdims=True))
    embeds = embeds * jnp.minimum(1.0, 2.0 / jnp.maximum(norms, 1e-7))

    b_r, b_z, b_h = jnp.split(bias, 3)
    h = jnp.zeros((B, H), jnp.float32)
    outs = []
    for t in range(S):
        x = embeds[:, t, :]
        gx = x @ wx.T
        gh = h @ wh.T
        i_r, i_z, i_h = jnp.split(gx, 3, axis=1)
        h_r, h_z, h_h = jnp.split(gh, 3, axis=1)
        r = jax.nn.sigmoid(i_r + h_r + b_r)
        z = jax.nn.sigmoid(i_z + h_z + b_z)
        n = jnp.tanh(i_h + r * h_h + b_h)
        h = n + z * (h - n)
        outs.append(h)
    rnn_out = jnp.stack(outs, axis=1)                   # (B, S, H)
    return rnn_out @ fcw.T + fcb


def init_params(key, ntokens, emsize, nhid):
    k = jax.random.split(key, 6)
    std = 1.0 / jnp.sqrt(jnp.float32(nhid))
    return {
        "emb_weight": jax.random.normal(k[0], (ntokens, emsize), jnp.float32),
        "x2h_weight": jax.random.uniform(k[1], (3 * nhid, emsize), jnp.float32, -std, std),
        "h2h_weight": jax.random.uniform(k[2], (3 * nhid, nhid), jnp.float32, -std, std),
        "gru_bias":   jax.random.uniform(k[3], (3 * nhid,), jnp.float32, -std, std),
        "fc_weight":  jax.random.uniform(k[4], (ntokens, nhid), jnp.float32, -std, std),
        "fc_bias":    jax.random.uniform(k[5], (ntokens,), jnp.float32, -std, std),
    }


if __name__ == "__main__":
    # --- test 1: small config, f32, strict tolerance ---------------------------------
    ntokens, emsize, nhid = 32, 16, 32
    batch, seq = 2, 8
    pkey, skey = jax.random.split(jax.random.PRNGKey(0))
    params = init_params(pkey, ntokens, emsize, nhid)
    sequence = jax.random.randint(skey, (batch, seq), 0, ntokens, dtype=jnp.int32)

    prepared = prepare_params(params)                      # once, outside jit
    fwd = jax.jit(gru_model_forward)
    logits = jax.block_until_ready(fwd(sequence, prepared))
    ref = jax.block_until_ready(_reference_forward(sequence, params))
    assert logits.shape == (batch, seq, ntokens)
    assert jnp.max(jnp.abs(logits - ref)) < 1e-3

    # --- test 2: forces multiple time chunks + 2 batch blocks + split-halves path ----
    ntokens2, emsize2, nhid2 = 64, 24, 40
    batch2, seq2 = 32, 10
    p2key, s2key = jax.random.split(jax.random.PRNGKey(1))
    params2 = init_params(p2key, ntokens2, emsize2, nhid2)
    sequence2 = jax.random.randint(s2key, (batch2, seq2), 0, ntokens2, dtype=jnp.int32)
    prepared2 = prepare_params(params2)
    fwd2 = jax.jit(functools.partial(gru_model_forward,
                                     recurrence_time_budget_bytes=192 * 1024,
                                     max_batch_block=16))
    logits2 = jax.block_until_ready(fwd2(sequence2, prepared2))
    ref2 = jax.block_until_ready(_reference_forward(sequence2, params2))
    assert logits2.shape == (batch2, seq2, ntokens2)
    assert jnp.max(jnp.abs(logits2 - ref2)) < 1e-3

    # --- test 3: bf16 MXU operands / intermediates, f32 accumulation -----------------
    prepared_bf16 = prepare_params(params, compute_dtype=jnp.bfloat16)
    logits_bf16 = jax.block_until_ready(fwd(sequence, prepared_bf16))
    assert bool(jnp.all(jnp.isfinite(logits_bf16)))
    assert jnp.max(jnp.abs(logits_bf16 - ref)) < 0.25

    print("KERNEL_OK")
</pallas_src>

<mosaic_0001>
module attributes {stable_mosaic.version = 11 : i64} {
  func.func @_matmul_bias_kernel(%arg0: i32, %arg1: i32, %arg2: i32, %arg3: memref<64x128xf32, #tpu.memory_space<vmem>>, %arg4: memref<128x384xf32, #tpu.memory_space<vmem>>, %arg5: memref<1x384xf32, #tpu.memory_space<vmem>>, %arg6: memref<64x384xf32, #tpu.memory_space<vmem>>, %arg7: memref<64x384xf32, #tpu.memory_space<vmem>>) attributes {dimension_semantics = [#tpu.dimension_semantics<parallel>, #tpu.dimension_semantics<parallel>, #tpu.dimension_semantics<arbitrary>], iteration_bounds = array<i64: 1, 1, 1>, scalar_prefetch = 0 : i64, scratch_operands = 1 : i64, tpu.core_type = #tpu.core_type<tc>, window_params = [{transform_indices = @transform_0, window_bounds = array<i64: 64, 128>}, {transform_indices = @transform_1, window_bounds = array<i64: 128, 384>}, {transform_indices = @transform_2, window_bounds = array<i64: 1, 384>}, {transform_indices = @transform_3, window_bounds = array<i64: 64, 384>}]} {
    %c0_i32 = arith.constant 0 : i32
    %0 = arith.cmpi eq, %arg2, %c0_i32 : i32
    %1 = arith.extui %0 : i1 to i32
    %c0_i32_0 = arith.constant 0 : i32
    %2 = arith.cmpi ne, %1, %c0_i32_0 : i32
    scf.if %2 {
      %cst_10 = arith.constant 0.000000e+00 : f32
      %12 = vector.broadcast %cst_10 : f32 to vector<64x384xf32>
      %c0_11 = arith.constant 0 : index
      %c0_12 = arith.constant 0 : index
      %13 = vector.load %arg7[%c0_11, %c0_12] : memref<64x384xf32, #tpu.memory_space<vmem>>, vector<64x384xf32>
      tpu.vector_store %arg7[%c0_11, %c0_12], %12 {strides = array<i32>} : memref<64x384xf32, #tpu.memory_space<vmem>>, vector<64x384xf32>,
    } else {
    }
    %c0 = arith.constant 0 : index
    %c0_1 = arith.constant 0 : index
    %3 = vector.load %arg7[%c0, %c0_1] : memref<64x384xf32, #tpu.memory_space<vmem>>, vector<64x384xf32>
    %c0_2 = arith.constant 0 : index
    %c0_3 = arith.constant 0 : index
    %4 = vector.load %arg3[%c0_2, %c0_3] : memref<64x128xf32, #tpu.memory_space<vmem>>, vector<64x128xf32>
    %c0_4 = arith.constant 0 : index
    %c0_5 = arith.constant 0 : index
    %5 = vector.load %arg4[%c0_4, %c0_5] : memref<128x384xf32, #tpu.memory_space<vmem>>, vector<128x384xf32>
    %cst = arith.constant dense<0.000000e+00> : vector<64x384xf32>
    %6 = tpu.matmul %4, %5, %cst {dimension_numbers = #tpu.dot_dimension_numbers<[1], [0], [0], [1], [0, 0, 1, 1], [], []>} : vector<64x128xf32>, vector<128x384xf32>, vector<64x384xf32> -> vector<64x384xf32>
    %7 = arith.addf %3, %6 : vector<64x384xf32>
    %c0_6 = arith.constant 0 : index
    %c0_7 = arith.constant 0 : index
    %8 = vector.load %arg7[%c0_6, %c0_7] : memref<64x384xf32, #tpu.memory_space<vmem>>, vector<64x384xf32>
    tpu.vector_store %arg7[%c0_6, %c0_7], %7 {strides = array<i32>} : memref<64x384xf32, #tpu.memory_space<vmem>>, vector<64x384xf32>,
    %c0_i32_8 = arith.constant 0 : i32
    %9 = arith.cmpi eq, %arg2, %c0_i32_8 : i32
    %10 = arith.extui %9 : i1 to i32
    %c0_i32_9 = arith.constant 0 : i32
    %11 = arith.cmpi ne, %10, %c0_i32_9 : i32
    scf.if %11 {
      %c0_10 = arith.constant 0 : index
      %c0_11 = arith.constant 0 : index
      %12 = vector.load %arg7[%c0_10, %c0_11] : memref<64x384xf32, #tpu.memory_space<vmem>>, vector<64x384xf32>
      %c0_12 = arith.constant 0 : index
      %c0_13 = arith.constant 0 : index
      %13 = vector.load %arg5[%c0_12, %c0_13] : memref<1x384xf32, #tpu.memory_space<vmem>>, vector<1x384xf32>
      %14 = vector.broadcast %13 : vector<1x384xf32> to vector<64x384xf32>
      %15 = arith.addf %12, %14 : vector<64x384xf32>
      %c0_14 = arith.constant 0 : index
      %c0_15 = arith.constant 0 : index
      %16 = vector.load %arg6[%c0_14, %c0_15] : memref<64x384xf32, #tpu.memory_space<vmem>>, vector<64x384xf32>
      tpu.vector_store %arg6[%c0_14, %c0_15], %15 {strides = array<i32>} : memref<64x384xf32, #tpu.memory_space<vmem>>, vector<64x384xf32>,
    } else {
    }
    return
  }
  func.func @transform_0(%arg0: i32, %arg1: i32, %arg2: i32) -> (i32, i32) {
    %c0_i32 = arith.constant 0 : i32
    return %arg0, %arg2 : i32, i32
  }
  func.func @transform_1(%arg0: i32, %arg1: i32, %arg2: i32) -> (i32, i32) {
    %c0_i32 = arith.constant 0 : i32
    return %arg2, %arg1 : i32, i32
  }
  func.func @transform_2(%arg0: i32, %arg1: i32, %arg2: i32) -> (i32, i32) {
    %c0_i32 = arith.constant 0 : i32
    %c0_i32_0 = arith.constant 0 : i32
    return %c0_i32, %arg1 : i32, i32
  }
  func.func @transform_3(%arg0: i32, %arg1: i32, %arg2: i32) -> (i32, i32) {
    %c0_i32 = arith.constant 0 : i32
    return %arg0, %arg1 : i32, i32
  }
}

module attributes {stable_mosaic.version = 11 : i64} {
  func.func @_matmul_bias_kernel(%arg0: i32, %arg1: i32, %arg2: i32, %arg3: memref<16x128xf32, #tpu.memory_space<vmem>>, %arg4: memref<128x128xf32, #tpu.memory_space<vmem>>, %arg5: memref<1x128xf32, #tpu.memory_space<vmem>>, %arg6: memref<16x128xf32, #tpu.memory_space<vmem>>, %arg7: memref<16x128xf32, #tpu.memory_space<vmem>>) attributes {dimension_semantics = [#tpu.dimension_semantics<parallel>, #tpu.dimension_semantics<parallel>, #tpu.dimension_semantics<arbitrary>], iteration_bounds = array<i64: 1, 1, 1>, scalar_prefetch = 0 : i64, scratch_operands = 1 : i64, tpu.core_type = #tpu.core_type<tc>, window_params = [{transform_indices = @transform_0, window_bounds = array<i64: 16, 128>}, {transform_indices = @transform_1, window_bounds = array<i64: 128, 128>}, {transform_indices = @transform_2, window_bounds = array<i64: 1, 128>}, {transform_indices = @transform_3, window_bounds = array<i64: 16, 128>}]} {
    %c0_i32 = arith.constant 0 : i32
    %0 = arith.cmpi eq, %arg2, %c0_i32 : i32
    %1 = arith.extui %0 : i1 to i32
    %c0_i32_0 = arith.constant 0 : i32
    %2 = arith.cmpi ne, %1, %c0_i32_0 : i32
    scf.if %2 {
      %cst_10 = arith.constant 0.000000e+00 : f32
      %12 = vector.broadcast %cst_10 : f32 to vector<16x128xf32>
      %c0_11 = arith.constant 0 : index
      %c0_12 = arith.constant 0 : index
      %13 = vector.load %arg7[%c0_11, %c0_12] : memref<16x128xf32, #tpu.memory_space<vmem>>, vector<16x128xf32>
      tpu.vector_store %arg7[%c0_11, %c0_12], %12 {strides = array<i32>} : memref<16x128xf32, #tpu.memory_space<vmem>>, vector<16x128xf32>,
    } else {
    }
    %c0 = arith.constant 0 : index
    %c0_1 = arith.constant 0 : index
    %3 = vector.load %arg7[%c0, %c0_1] : memref<16x128xf32, #tpu.memory_space<vmem>>, vector<16x128xf32>
    %c0_2 = arith.constant 0 : index
    %c0_3 = arith.constant 0 : index
    %4 = vector.load %arg3[%c0_2, %c0_3] : memref<16x128xf32, #tpu.memory_space<vmem>>, vector<16x128xf32>
    %c0_4 = arith.constant 0 : index
    %c0_5 = arith.constant 0 : index
    %5 = vector.load %arg4[%c0_4, %c0_5] : memref<128x128xf32, #tpu.memory_space<vmem>>, vector<128x128xf32>
    %cst = arith.constant dense<0.000000e+00> : vector<16x128xf32>
    %6 = tpu.matmul %4, %5, %cst {dimension_numbers = #tpu.dot_dimension_numbers<[1], [0], [0], [1], [0, 0, 1, 1], [], []>} : vector<16x128xf32>, vector<128x128xf32>, vector<16x128xf32> -> vector<16x128xf32>
    %7 = arith.addf %3, %6 : vector<16x128xf32>
    %c0_6 = arith.constant 0 : index
    %c0_7 = arith.constant 0 : index
    %8 = vector.load %arg7[%c0_6, %c0_7] : memref<16x128xf32, #tpu.memory_space<vmem>>, vector<16x128xf32>
    tpu.vector_store %arg7[%c0_6, %c0_7], %7 {strides = array<i32>} : memref<16x128xf32, #tpu.memory_space<vmem>>, vector<16x128xf32>,
    %c0_i32_8 = arith.constant 0 : i32
    %9 = arith.cmpi eq, %arg2, %c0_i32_8 : i32
    %10 = arith.extui %9 : i1 to i32
    %c0_i32_9 = arith.constant 0 : i32
    %11 = arith.cmpi ne, %10, %c0_i32_9 : i32
    scf.if %11 {
      %c0_10 = arith.constant 0 : index
      %c0_11 = arith.constant 0 : index
      %12 = vector.load %arg7[%c0_10, %c0_11] : memref<16x128xf32, #tpu.memory_space<vmem>>, vector<16x128xf32>
      %c0_12 = arith.constant 0 : index
      %c0_13 = arith.constant 0 : index
      %13 = vector.load %arg5[%c0_12, %c0_13] : memref<1x128xf32, #tpu.memory_space<vmem>>, vector<1x128xf32>
      %14 = vector.broadcast %13 : vector<1x128xf32> to vector<16x128xf32>
      %15 = arith.addf %12, %14 : vector<16x128xf32>
      %c0_14 = arith.constant 0 : index
      %c0_15 = arith.constant 0 : index
      %16 = vector.load %arg6[%c0_14, %c0_15] : memref<16x128xf32, #tpu.memory_space<vmem>>, vector<16x128xf32>
      tpu.vector_store %arg6[%c0_14, %c0_15], %15 {strides = array<i32>} : memref<16x128xf32, #tpu.memory_space<vmem>>, vector<16x128xf32>,
    } else {
    }
    return
  }
  func.func @transform_0(%arg0: i32, %arg1: i32, %arg2: i32) -> (i32, i32) {
    %c0_i32 = arith.constant 0 : i32
    return %arg0, %arg2 : i32, i32
  }
  func.func @transform_1(%arg0: i32, %arg1: i32, %arg2: i32) -> (i32, i32) {
    %c0_i32 = arith.constant 0 : i32
    return %arg2, %arg1 : i32, i32
  }
  func.func @transform_2(%arg0: i32, %arg1: i32, %arg2: i32) -> (i32, i32) {
    %c0_i32 = arith.constant 0 : i32
    %c0_i32_0 = arith.constant 0 : i32
    return %c0_i32, %arg1 : i32, i32
  }
  func.func @transform_3(%arg0: i32, %arg1: i32, %arg2: i32) -> (i32, i32) {
    %c0_i32 = arith.constant 0 : i32
    return %arg0, %arg1 : i32, i32
  }
}

module attributes {stable_mosaic.version = 11 : i64} {
  func.func @_gru_recurrence_kernel(%arg0: i32, %arg1: i32, %arg2: memref<8x8x384xf32, #tpu.memory_space<vmem>>, %arg3: memref<128x384xf32, #tpu.memory_space<vmem>>, %arg4: memref<8x8x128xf32, #tpu.memory_space<vmem>>, %arg5: memref<8x128xf32, #tpu.memory_space<vmem>>) attributes {dimension_semantics = [#tpu.dimension_semantics<parallel>, #tpu.dimension_semantics<arbitrary>], iteration_bounds = array<i64: 1, 1>, scalar_prefetch = 0 : i64, scratch_operands = 1 : i64, tpu.core_type = #tpu.core_type<tc>, window_params = [{transform_indices = @transform_0, window_bounds = array<i64: 8, 8, 384>}, {pipeline_mode = #tpu.pipeline_mode<synchronous>, transform_indices = @transform_1, window_bounds = array<i64: 128, 384>}, {transform_indices = @transform_2, window_bounds = array<i64: 8, 8, 128>}]} {
    %c0_i32 = arith.constant 0 : i32
    %0 = arith.cmpi eq, %arg1, %c0_i32 : i32
    %1 = arith.extui %0 : i1 to i32
    %c0_i32_0 = arith.constant 0 : i32
    %2 = arith.cmpi ne, %1, %c0_i32_0 : i32
    scf.if %2 {
      %cst_94 = arith.constant 0.000000e+00 : f32
      %294 = vector.broadcast %cst_94 : f32 to vector<8x128xf32>
      %c0_95 = arith.constant 0 : index
      %c0_96 = arith.constant 0 : index
      %295 = vector.load %arg5[%c0_95, %c0_96] : memref<8x128xf32, #tpu.memory_space<vmem>>, vector<8x128xf32>
      tpu.vector_store %arg5[%c0_95, %c0_96], %294 {strides = array<i32>} : memref<8x128xf32, #tpu.memory_space<vmem>>, vector<8x128xf32>,
    } else {
    }
    %c0 = arith.constant 0 : index
    %c0_1 = arith.constant 0 : index
    %3 = vector.load %arg3[%c0, %c0_1] : memref<128x384xf32, #tpu.memory_space<vmem>>, vector<128x384xf32>
    %c0_2 = arith.constant 0 : index
    %c0_3 = arith.constant 0 : index
    %4 = vector.load %arg5[%c0_2, %c0_3] : memref<8x128xf32, #tpu.memory_space<vmem>>, vector<8x128xf32>
    %c0_i32_4 = arith.constant 0 : i32
    %5 = arith.index_cast %c0_i32_4 : i32 to index
    %c0_5 = arith.constant 0 : index
    %c0_6 = arith.constant 0 : index
    %6 = vector.load %arg2[%5, %c0_5, %c0_6] : memref<8x8x384xf32, #tpu.memory_space<vmem>>, vector<1x8x384xf32>
    %7 = vector.shape_cast %6 : vector<1x8x384xf32> to vector<8x384xf32>
    %cst = arith.constant dense<0.000000e+00> : vector<8x384xf32>
    %8 = tpu.matmul %4, %3, %cst {dimension_numbers = #tpu.dot_dimension_numbers<[1], [0], [0], [1], [0, 0, 1, 1], [], []>} : vector<8x128xf32>, vector<128x384xf32>, vector<8x384xf32> -> vector<8x384xf32>
    %9 = vector.extract_strided_slice %7 {offsets = [0, 0], sizes = [8, 128], strides = [1, 1]} : vector<8x384xf32> to vector<8x128xf32>
    %10 = vector.extract_strided_slice %8 {offsets = [0, 0], sizes = [8, 128], strides = [1, 1]} : vector<8x384xf32> to vector<8x128xf32>
    %11 = arith.addf %9, %10 : vector<8x128xf32>
    %cst_7 = arith.constant 5.000000e-01 : f32
    %12 = vector.broadcast %cst_7 : f32 to vector<8x128xf32>
    %13 = arith.mulf %12, %11 : vector<8x128xf32>
    %14 = math.tanh %13 : vector<8x128xf32>
    %cst_8 = arith.constant 1.000000e+00 : f32
    %15 = vector.broadcast %cst_8 : f32 to vector<8x128xf32>
    %16 = arith.addf %14, %15 : vector<8x128xf32>
    %cst_9 = arith.constant 5.000000e-01 : f32
    %17 = vector.broadcast %cst_9 : f32 to vector<8x128xf32>
    %18 = arith.mulf %17, %16 : vector<8x128xf32>
    %19 = vector.extract_strided_slice %7 {offsets = [0, 128], sizes = [8, 128], strides = [1, 1]} : vector<8x384xf32> to vector<8x128xf32>
    %20 = vector.extract_strided_slice %8 {offsets = [0, 128], sizes = [8, 128], strides = [1, 1]} : vector<8x384xf32> to vector<8x128xf32>
    %21 = arith.addf %19, %20 : vector<8x128xf32>
    %cst_10 = arith.constant 5.000000e-01 : f32
    %22 = vector.broadcast %cst_10 : f32 to vector<8x128xf32>
    %23 = arith.mulf %22, %21 : vector<8x128xf32>
    %24 = math.tanh %23 : vector<8x128xf32>
    %cst_11 = arith.constant 1.000000e+00 : f32
    %25 = vector.broadcast %cst_11 : f32 to vector<8x128xf32>
    %26 = arith.addf %24, %25 : vector<8x128xf32>
    %cst_12 = arith.constant 5.000000e-01 : f32
    %27 = vector.broadcast %cst_12 : f32 to vector<8x128xf32>
    %28 = arith.mulf %27, %26 : vector<8x128xf32>
    %29 = vector.extract_strided_slice %7 {offsets = [0, 256], sizes = [8, 128], strides = [1, 1]} : vector<8x384xf32> to vector<8x128xf32>
    %30 = vector.extract_strided_slice %8 {offsets = [0, 256], sizes = [8, 128], strides = [1, 1]} : vector<8x384xf32> to vector<8x128xf32>
    %31 = arith.mulf %18, %30 : vector<8x128xf32>
    %32 = arith.addf %29, %31 : vector<8x128xf32>
    %33 = math.tanh %32 : vector<8x128xf32>
    %34 = arith.subf %4, %33 : vector<8x128xf32>
    %35 = arith.mulf %28, %34 : vector<8x128xf32>
    %36 = arith.addf %33, %35 : vector<8x128xf32>
    %37 = arith.index_cast %c0_i32_4 : i32 to index
    %c0_13 = arith.constant 0 : index
    %c0_14 = arith.constant 0 : index
    %38 = vector.load %arg4[%37, %c0_13, %c0_14] : memref<8x8x128xf32, #tpu.memory_space<vmem>>, vector<1x8x128xf32>
    %39 = vector.shape_cast %38 : vector<1x8x128xf32> to vector<8x128xf32>
    %40 = vector.shape_cast %36 : vector<8x128xf32> to vector<1x8x128xf32>
    tpu.vector_store %arg4[%37, %c0_13, %c0_14], %40 {strides = array<i32>} : memref<8x8x128xf32, #tpu.memory_space<vmem>>, vector<1x8x128xf32>,
    %c1_i32 = arith.constant 1 : i32
    %41 = arith.index_cast %c1_i32 : i32 to index
    %c0_15 = arith.constant 0 : index
    %c0_16 = arith.constant 0 : index
    %42 = vector.load %arg2[%41, %c0_15, %c0_16] : memref<8x8x384xf32, #tpu.memory_space<vmem>>, vector<1x8x384xf32>
    %43 = vector.shape_cast %42 : vector<1x8x384xf32> to vector<8x384xf32>
    %cst_17 = arith.constant dense<0.000000e+00> : vector<8x384xf32>
    %44 = tpu.matmul %36, %3, %cst_17 {dimension_numbers = #tpu.dot_dimension_numbers<[1], [0], [0], [1], [0, 0, 1, 1], [], []>} : vector<8x128xf32>, vector<128x384xf32>, vector<8x384xf32> -> vector<8x384xf32>
    %45 = vector.extract_strided_slice %43 {offsets = [0, 0], sizes = [8, 128], strides = [1, 1]} : vector<8x384xf32> to vector<8x128xf32>
    %46 = vector.extract_strided_slice %44 {offsets = [0, 0], sizes = [8, 128], strides = [1, 1]} : vector<8x384xf32> to vector<8x128xf32>
    %47 = arith.addf %45, %46 : vector<8x128xf32>
    %cst_18 = arith.constant 5.000000e-01 : f32
    %48 = vector.broadcast %cst_18 : f32 to vector<8x128xf32>
    %49 = arith.mulf %48, %47 : vector<8x128xf32>
    %50 = math.tanh %49 : vector<8x128xf32>
    %cst_19 = arith.constant 1.000000e+00 : f32
    %51 = vector.broadcast %cst_19 : f32 to vector<8x128xf32>
    %52 = arith.addf %50, %51 : vector<8x128xf32>
    %cst_20 = arith.constant 5.000000e-01 : f32
    %53 = vector.broadcast %cst_20 : f32 to vector<8x128xf32>
    %54 = arith.mulf %53, %52 : vector<8x128xf32>
    %55 = vector.extract_strided_slice %43 {offsets = [0, 128], sizes = [8, 128], strides = [1, 1]} : vector<8x384xf32> to vector<8x128xf32>
    %56 = vector.extract_strided_slice %44 {offsets = [0, 128], sizes = [8, 128], strides = [1, 1]} : vector<8x384xf32> to vector<8x128xf32>
    %57 = arith.addf %55, %56 : vector<8x128xf32>
    %cst_21 = arith.constant 5.000000e-01 : f32
    %58 = vector.broadcast %cst_21 : f32 to vector<8x128xf32>
    %59 = arith.mulf %58, %57 : vector<8x128xf32>
    %60 = math.tanh %59 : vector<8x128xf32>
    %cst_22 = arith.constant 1.000000e+00 : f32
    %61 = vector.broadcast %cst_22 : f32 to vector<8x128xf32>
    %62 = arith.addf %60, %61 : vector<8x128xf32>
    %cst_23 = arith.constant 5.000000e-01 : f32
    %63 = vector.broadcast %cst_23 : f32 to vector<8x128xf32>
    %64 = arith.mulf %63, %62 : vector<8x128xf32>
    %65 = vector.extract_strided_slice %43 {offsets = [0, 256], sizes = [8, 128], strides = [1, 1]} : vector<8x384xf32> to vector<8x128xf32>
    %66 = vector.extract_strided_slice %44 {offsets = [0, 256], sizes = [8, 128], strides = [1, 1]} : vector<8x384xf32> to vector<8x128xf32>
    %67 = arith.mulf %54, %66 : vector<8x128xf32>
    %68 = arith.addf %65, %67 : vector<8x128xf32>
    %69 = math.tanh %68 : vector<8x128xf32>
    %70 = arith.subf %36, %69 : vector<8x128xf32>
    %71 = arith.mulf %64, %70 : vector<8x128xf32>
    %72 = arith.addf %69, %71 : vector<8x128xf32>
    %73 = arith.index_cast %c1_i32 : i32 to index
    %c0_24 = arith.constant 0 : index
    %c0_25 = arith.constant 0 : index
    %74 = vector.load %arg4[%73, %c0_24, %c0_25] : memref<8x8x128xf32, #tpu.memory_space<vmem>>, vector<1x8x128xf32>
    %75 = vector.shape_cast %74 : vector<1x8x128xf32> to vector<8x128xf32>
    %76 = vector.shape_cast %72 : vector<8x128xf32> to vector<1x8x128xf32>
    tpu.vector_store %arg4[%73, %c0_24, %c0_25], %76 {strides = array<i32>} : memref<8x8x128xf32, #tpu.memory_space<vmem>>, vector<1x8x128xf32>,
    %c2_i32 = arith.constant 2 : i32
    %77 = arith.index_cast %c2_i32 : i32 to index
    %c0_26 = arith.constant 0 : index
    %c0_27 = arith.constant 0 : index
    %78 = vector.load %arg2[%77, %c0_26, %c0_27] : memref<8x8x384xf32, #tpu.memory_space<vmem>>, vector<1x8x384xf32>
    %79 = vector.shape_cast %78 : vector<1x8x384xf32> to vector<8x384xf32>
    %cst_28 = arith.constant dense<0.000000e+00> : vector<8x384xf32>
    %80 = tpu.matmul %72, %3, %cst_28 {dimension_numbers = #tpu.dot_dimension_numbers<[1], [0], [0], [1], [0, 0, 1, 1], [], []>} : vector<8x128xf32>, vector<128x384xf32>, vector<8x384xf32> -> vector<8x384xf32>
    %81 = vector.extract_strided_slice %79 {offsets = [0, 0], sizes = [8, 128], strides = [1, 1]} : vector<8x384xf32> to vector<8x128xf32>
    %82 = vector.extract_strided_slice %80 {offsets = [0, 0], sizes = [8, 128], strides = [1, 1]} : vector<8x384xf32> to vector<8x128xf32>
    %83 = arith.addf %81, %82 : vector<8x128xf32>
    %cst_29 = arith.constant 5.000000e-01 : f32
    %84 = vector.broadcast %cst_29 : f32 to vector<8x128xf32>
    %85 = arith.mulf %84, %83 : vector<8x128xf32>
    %86 = math.tanh %85 : vector<8x128xf32>
    %cst_30 = arith.constant 1.000000e+00 : f32
    %87 = vector.broadcast %cst_30 : f32 to vector<8x128xf32>
    %88 = arith.addf %86, %87 : vector<8x128xf32>
    %cst_31 = arith.constant 5.000000e-01 : f32
    %89 = vector.broadcast %cst_31 : f32 to vector<8x128xf32>
    %90 = arith.mulf %89, %88 : vector<8x128xf32>
    %91 = vector.extract_strided_slice %79 {offsets = [0, 128], sizes = [8, 128], strides = [1, 1]} : vector<8x384xf32> to vector<8x128xf32>
    %92 = vector.extract_strided_slice %80 {offsets = [0, 128], sizes = [8, 128], strides = [1, 1]} : vector<8x384xf32> to vector<8x128xf32>
    %93 = arith.addf %91, %92 : vector<8x128xf32>
    %cst_32 = arith.constant 5.000000e-01 : f32
    %94 = vector.broadcast %cst_32 : f32 to vector<8x128xf32>
    %95 = arith.mulf %94, %93 : vector<8x128xf32>
    %96 = math.tanh %95 : vector<8x128xf32>
    %cst_33 = arith.constant 1.000000e+00 : f32
    %97 = vector.broadcast %cst_33 : f32 to vector<8x128xf32>
    %98 = arith.addf %96, %97 : vector<8x128xf32>
    %cst_34 = arith.constant 5.000000e-01 : f32
    %99 = vector.broadcast %cst_34 : f32 to vector<8x128xf32>
    %100 = arith.mulf %99, %98 : vector<8x128xf32>
    %101 = vector.extract_strided_slice %79 {offsets = [0, 256], sizes = [8, 128], strides = [1, 1]} : vector<8x384xf32> to vector<8x128xf32>
    %102 = vector.extract_strided_slice %80 {offsets = [0, 256], sizes = [8, 128], strides = [1, 1]} : vector<8x384xf32> to vector<8x128xf32>
    %103 = arith.mulf %90, %102 : vector<8x128xf32>
    %104 = arith.addf %101, %103 : vector<8x128xf32>
    %105 = math.tanh %104 : vector<8x128xf32>
    %106 = arith.subf %72, %105 : vector<8x128xf32>
    %107 = arith.mulf %100, %106 : vector<8x128xf32>
    %108 = arith.addf %105, %107 : vector<8x128xf32>
    %109 = arith.index_cast %c2_i32 : i32 to index
    %c0_35 = arith.constant 0 : index
    %c0_36 = arith.constant 0 : index
    %110 = vector.load %arg4[%109, %c0_35, %c0_36] : memref<8x8x128xf32, #tpu.memory_space<vmem>>, vector<1x8x128xf32>
    %111 = vector.shape_cast %110 : vector<1x8x128xf32> to vector<8x128xf32>
    %112 = vector.shape_cast %108 : vector<8x128xf32> to vector<1x8x128xf32>
    tpu.vector_store %arg4[%109, %c0_35, %c0_36], %112 {strides = array<i32>} : memref<8x8x128xf32, #tpu.memory_space<vmem>>, vector<1x8x128xf32>,
    %c3_i32 = arith.constant 3 : i32
    %113 = arith.index_cast %c3_i32 : i32 to index
    %c0_37 = arith.constant 0 : index
    %c0_38 = arith.constant 0 : index
    %114 = vector.load %arg2[%113, %c0_37, %c0_38] : memref<8x8x384xf32, #tpu.memory_space<vmem>>, vector<1x8x384xf32>
    %115 = vector.shape_cast %114 : vector<1x8x384xf32> to vector<8x384xf32>
    %cst_39 = arith.constant dense<0.000000e+00> : vector<8x384xf32>
    %116 = tpu.matmul %108, %3, %cst_39 {dimension_numbers = #tpu.dot_dimension_numbers<[1], [0], [0], [1], [0, 0, 1, 1], [], []>} : vector<8x128xf32>, vector<128x384xf32>, vector<8x384xf32> -> vector<8x384xf32>
    %117 = vector.extract_strided_slice %115 {offsets = [0, 0], sizes = [8, 128], strides = [1, 1]} : vector<8x384xf32> to vector<8x128xf32>
    %118 = vector.extract_strided_slice %116 {offsets = [0, 0], sizes = [8, 128], strides = [1, 1]} : vector<8x384xf32> to vector<8x128xf32>
    %119 = arith.addf %117, %118 : vector<8x128xf32>
    %cst_40 = arith.constant 5.000000e-01 : f32
    %120 = vector.broadcast %cst_40 : f32 to vector<8x128xf32>
    %121 = arith.mulf %120, %119 : vector<8x128xf32>
    %122 = math.tanh %121 : vector<8x128xf32>
    %cst_41 = arith.constant 1.000000e+00 : f32
    %123 = vector.broadcast %cst_41 : f32 to vector<8x128xf32>
    %124 = arith.addf %122, %123 : vector<8x128xf32>
    %cst_42 = arith.constant 5.000000e-01 : f32
    %125 = vector.broadcast %cst_42 : f32 to vector<8x128xf32>
    %126 = arith.mulf %125, %124 : vector<8x128xf32>
    %127 = vector.extract_strided_slice %115 {offsets = [0, 128], sizes = [8, 128], strides = [1, 1]} : vector<8x384xf32> to vector<8x128xf32>
    %128 = vector.extract_strided_slice %116 {offsets = [0, 128], sizes = [8, 128], strides = [1, 1]} : vector<8x384xf32> to vector<8x128xf32>
    %129 = arith.addf %127, %128 : vector<8x128xf32>
    %cst_43 = arith.constant 5.000000e-01 : f32
    %130 = vector.broadcast %cst_43 : f32 to vector<8x128xf32>
    %131 = arith.mulf %130, %129 : vector<8x128xf32>
    %132 = math.tanh %131 : vector<8x128xf32>
    %cst_44 = arith.constant 1.000000e+00 : f32
    %133 = vector.broadcast %cst_44 : f32 to vector<8x128xf32>
    %134 = arith.addf %132, %133 : vector<8x128xf32>
    %cst_45 = arith.constant 5.000000e-01 : f32
    %135 = vector.broadcast %cst_45 : f32 to vector<8x128xf32>
    %136 = arith.mulf %135, %134 : vector<8x128xf32>
    %137 = vector.extract_strided_slice %115 {offsets = [0, 256], sizes = [8, 128], strides = [1, 1]} : vector<8x384xf32> to vector<8x128xf32>
    %138 = vector.extract_strided_slice %116 {offsets = [0, 256], sizes = [8, 128], strides = [1, 1]} : vector<8x384xf32> to vector<8x128xf32>
    %139 = arith.mulf %126, %138 : vector<8x128xf32>
    %140 = arith.addf %137, %139 : vector<8x128xf32>
    %141 = math.tanh %140 : vector<8x128xf32>
    %142 = arith.subf %108, %141 : vector<8x128xf32>
    %143 = arith.mulf %136, %142 : vector<8x128xf32>
    %144 = arith.addf %141, %143 : vector<8x128xf32>
    %145 = arith.index_cast %c3_i32 : i32 to index
    %c0_46 = arith.constant 0 : index
    %c0_47 = arith.constant 0 : index
    %146 = vector.load %arg4[%145, %c0_46, %c0_47] : memref<8x8x128xf32, #tpu.memory_space<vmem>>, vector<1x8x128xf32>
    %147 = vector.shape_cast %146 : vector<1x8x128xf32> to vector<8x128xf32>
    %148 = vector.shape_cast %144 : vector<8x128xf32> to vector<1x8x128xf32>
    tpu.vector_store %arg4[%145, %c0_46, %c0_47], %148 {strides = array<i32>} : memref<8x8x128xf32, #tpu.memory_space<vmem>>, vector<1x8x128xf32>,
    %c4_i32 = arith.constant 4 : i32
    %149 = arith.index_cast %c4_i32 : i32 to index
    %c0_48 = arith.constant 0 : index
    %c0_49 = arith.constant 0 : index
    %150 = vector.load %arg2[%149, %c0_48, %c0_49] : memref<8x8x384xf32, #tpu.memory_space<vmem>>, vector<1x8x384xf32>
    %151 = vector.shape_cast %150 : vector<1x8x384xf32> to vector<8x384xf32>
    %cst_50 = arith.constant dense<0.000000e+00> : vector<8x384xf32>
    %152 = tpu.matmul %144, %3, %cst_50 {dimension_numbers = #tpu.dot_dimension_numbers<[1], [0], [0], [1], [0, 0, 1, 1], [], []>} : vector<8x128xf32>, vector<128x384xf32>, vector<8x384xf32> -> vector<8x384xf32>
    %153 = vector.extract_strided_slice %151 {offsets = [0, 0], sizes = [8, 128], strides = [1, 1]} : vector<8x384xf32> to vector<8x128xf32>
    %154 = vector.extract_strided_slice %152 {offsets = [0, 0], sizes = [8, 128], strides = [1, 1]} : vector<8x384xf32> to vector<8x128xf32>
    %155 = arith.addf %153, %154 : vector<8x128xf32>
    %cst_51 = arith.constant 5.000000e-01 : f32
    %156 = vector.broadcast %cst_51 : f32 to vector<8x128xf32>
    %157 = arith.mulf %156, %155 : vector<8x128xf32>
    %158 = math.tanh %157 : vector<8x128xf32>
    %cst_52 = arith.constant 1.000000e+00 : f32
    %159 = vector.broadcast %cst_52 : f32 to vector<8x128xf32>
    %160 = arith.addf %158, %159 : vector<8x128xf32>
    %cst_53 = arith.constant 5.000000e-01 : f32
    %161 = vector.broadcast %cst_53 : f32 to vector<8x128xf32>
    %162 = arith.mulf %161, %160 : vector<8x128xf32>
    %163 = vector.extract_strided_slice %151 {offsets = [0, 128], sizes = [8, 128], strides = [1, 1]} : vector<8x384xf32> to vector<8x128xf32>
    %164 = vector.extract_strided_slice %152 {offsets = [0, 128], sizes = [8, 128], strides = [1, 1]} : vector<8x384xf32> to vector<8x128xf32>
    %165 = arith.addf %163, %164 : vector<8x128xf32>
    %cst_54 = arith.constant 5.000000e-01 : f32
    %166 = vector.broadcast %cst_54 : f32 to vector<8x128xf32>
    %167 = arith.mulf %166, %165 : vector<8x128xf32>
    %168 = math.tanh %167 : vector<8x128xf32>
    %cst_55 = arith.constant 1.000000e+00 : f32
    %169 = vector.broadcast %cst_55 : f32 to vector<8x128xf32>
    %170 = arith.addf %168, %169 : vector<8x128xf32>
    %cst_56 = arith.constant 5.000000e-01 : f32
    %171 = vector.broadcast %cst_56 : f32 to vector<8x128xf32>
    %172 = arith.mulf %171, %170 : vector<8x128xf32>
    %173 = vector.extract_strided_slice %151 {offsets = [0, 256], sizes = [8, 128], strides = [1, 1]} : vector<8x384xf32> to vector<8x128xf32>
    %174 = vector.extract_strided_slice %152 {offsets = [0, 256], sizes = [8, 128], strides = [1, 1]} : vector<8x384xf32> to vector<8x128xf32>
    %175 = arith.mulf %162, %174 : vector<8x128xf32>
    %176 = arith.addf %173, %175 : vector<8x128xf32>
    %177 = math.tanh %176 : vector<8x128xf32>
    %178 = arith.subf %144, %177 : vector<8x128xf32>
    %179 = arith.mulf %172, %178 : vector<8x128xf32>
    %180 = arith.addf %177, %179 : vector<8x128xf32>
    %181 = arith.index_cast %c4_i32 : i32 to index
    %c0_57 = arith.constant 0 : index
    %c0_58 = arith.constant 0 : index
    %182 = vector.load %arg4[%181, %c0_57, %c0_58] : memref<8x8x128xf32, #tpu.memory_space<vmem>>, vector<1x8x128xf32>
    %183 = vector.shape_cast %182 : vector<1x8x128xf32> to vector<8x128xf32>
    %184 = vector.shape_cast %180 : vector<8x128xf32> to vector<1x8x128xf32>
    tpu.vector_store %arg4[%181, %c0_57, %c0_58], %184 {strides = array<i32>} : memref<8x8x128xf32, #tpu.memory_space<vmem>>, vector<1x8x128xf32>,
    %c5_i32 = arith.constant 5 : i32
    %185 = arith.index_cast %c5_i32 : i32 to index
    %c0_59 = arith.constant 0 : index
    %c0_60 = arith.constant 0 : index
    %186 = vector.load %arg2[%185, %c0_59, %c0_60] : memref<8x8x384xf32, #tpu.memory_space<vmem>>, vector<1x8x384xf32>
    %187 = vector.shape_cast %186 : vector<1x8x384xf32> to vector<8x384xf32>
    %cst_61 = arith.constant dense<0.000000e+00> : vector<8x384xf32>
    %188 = tpu.matmul %180, %3, %cst_61 {dimension_numbers = #tpu.dot_dimension_numbers<[1], [0], [0], [1], [0, 0, 1, 1], [], []>} : vector<8x128xf32>, vector<128x384xf32>, vector<8x384xf32> -> vector<8x384xf32>
    %189 = vector.extract_strided_slice %187 {offsets = [0, 0], sizes = [8, 128], strides = [1, 1]} : vector<8x384xf32> to vector<8x128xf32>
    %190 = vector.extract_strided_slice %188 {offsets = [0, 0], sizes = [8, 128], strides = [1, 1]} : vector<8x384xf32> to vector<8x128xf32>
    %191 = arith.addf %189, %190 : vector<8x128xf32>
    %cst_62 = arith.constant 5.000000e-01 : f32
    %192 = vector.broadcast %cst_62 : f32 to vector<8x128xf32>
    %193 = arith.mulf %192, %191 : vector<8x128xf32>
    %194 = math.tanh %193 : vector<8x128xf32>
    %cst_63 = arith.constant 1.000000e+00 : f32
    %195 = vector.broadcast %cst_63 : f32 to vector<8x128xf32>
    %196 = arith.addf %194, %195 : vector<8x128xf32>
    %cst_64 = arith.constant 5.000000e-01 : f32
    %197 = vector.broadcast %cst_64 : f32 to vector<8x128xf32>
    %198 = arith.mulf %197, %196 : vector<8x128xf32>
    %199 = vector.extract_strided_slice %187 {offsets = [0, 128], sizes = [8, 128], strides = [1, 1]} : vector<8x384xf32> to vector<8x128xf32>
    %200 = vector.extract_strided_slice %188 {offsets = [0, 128], sizes = [8, 128], strides = [1, 1]} : vector<8x384xf32> to vector<8x128xf32>
    %201 = arith.addf %199, %200 : vector<8x128xf32>
    %cst_65 = arith.constant 5.000000e-01 : f32
    %202 = vector.broadcast %cst_65 : f32 to vector<8x128xf32>
    %203 = arith.mulf %202, %201 : vector<8x128xf32>
    %204 = math.tanh %203 : vector<8x128xf32>
    %cst_66 = arith.constant 1.000000e+00 : f32
    %205 = vector.broadcast %cst_66 : f32 to vector<8x128xf32>
    %206 = arith.addf %204, %205 : vector<8x128xf32>
    %cst_67 = arith.constant 5.000000e-01 : f32
    %207 = vector.broadcast %cst_67 : f32 to vector<8x128xf32>
    %208 = arith.mulf %207, %206 : vector<8x128xf32>
    %209 = vector.extract_strided_slice %187 {offsets = [0, 256], sizes = [8, 128], strides = [1, 1]} : vector<8x384xf32> to vector<8x128xf32>
    %210 = vector.extract_strided_slice %188 {offsets = [0, 256], sizes = [8, 128], strides = [1, 1]} : vector<8x384xf32> to vector<8x128xf32>
    %211 = arith.mulf %198, %210 : vector<8x128xf32>
    %212 = arith.addf %209, %211 : vector<8x128xf32>
    %213 = math.tanh %212 : vector<8x128xf32>
    %214 = arith.subf %180, %213 : vector<8x128xf32>
    %215 = arith.mulf %208, %214 : vector<8x128xf32>
    %216 = arith.addf %213, %215 : vector<8x128xf32>
    %217 = arith.index_cast %c5_i32 : i32 to index
    %c0_68 = arith.constant 0 : index
    %c0_69 = arith.constant 0 : index
    %218 = vector.load %arg4[%217, %c0_68, %c0_69] : memref<8x8x128xf32, #tpu.memory_space<vmem>>, vector<1x8x128xf32>
    %219 = vector.shape_cast %218 : vector<1x8x128xf32> to vector<8x128xf32>
    %220 = vector.shape_cast %216 : vector<8x128xf32> to vector<1x8x128xf32>
    tpu.vector_store %arg4[%217, %c0_68, %c0_69], %220 {strides = array<i32>} : memref<8x8x128xf32, #tpu.memory_space<vmem>>, vector<1x8x128xf32>,
    %c6_i32 = arith.constant 6 : i32
    %221 = arith.index_cast %c6_i32 : i32 to index
    %c0_70 = arith.constant 0 : index
    %c0_71 = arith.constant 0 : index
    %222 = vector.load %arg2[%221, %c0_70, %c0_71] : memref<8x8x384xf32, #tpu.memory_space<vmem>>, vector<1x8x384xf32>
    %223 = vector.shape_cast %222 : vector<1x8x384xf32> to vector<8x384xf32>
    %cst_72 = arith.constant dense<0.000000e+00> : vector<8x384xf32>
    %224 = tpu.matmul %216, %3, %cst_72 {dimension_numbers = #tpu.dot_dimension_numbers<[1], [0], [0], [1], [0, 0, 1, 1], [], []>} : vector<8x128xf32>, vector<128x384xf32>, vector<8x384xf32> -> vector<8x384xf32>
    %225 = vector.extract_strided_slice %223 {offsets = [0, 0], sizes = [8, 128], strides = [1, 1]} : vector<8x384xf32> to vector<8x128xf32>
    %226 = vector.extract_strided_slice %224 {offsets = [0, 0], sizes = [8, 128], strides = [1, 1]} : vector<8x384xf32> to vector<8x128xf32>
    %227 = arith.addf %225, %226 : vector<8x128xf32>
    %cst_73 = arith.constant 5.000000e-01 : f32
    %228 = vector.broadcast %cst_73 : f32 to vector<8x128xf32>
    %229 = arith.mulf %228, %227 : vector<8x128xf32>
    %230 = math.tanh %229 : vector<8x128xf32>
    %cst_74 = arith.constant 1.000000e+00 : f32
    %231 = vector.broadcast %cst_74 : f32 to vector<8x128xf32>
    %232 = arith.addf %230, %231 : vector<8x128xf32>
    %cst_75 = arith.constant 5.000000e-01 : f32
    %233 = vector.broadcast %cst_75 : f32 to vector<8x128xf32>
    %234 = arith.mulf %233, %232 : vector<8x128xf32>
    %235 = vector.extract_strided_slice %223 {offsets = [0, 128], sizes = [8, 128], strides = [1, 1]} : vector<8x384xf32> to vector<8x128xf32>
    %236 = vector.extract_strided_slice %224 {offsets = [0, 128], sizes = [8, 128], strides = [1, 1]} : vector<8x384xf32> to vector<8x128xf32>
    %237 = arith.addf %235, %236 : vector<8x128xf32>
    %cst_76 = arith.constant 5.000000e-01 : f32
    %238 = vector.broadcast %cst_76 : f32 to vector<8x128xf32>
    %239 = arith.mulf %238, %237 : vector<8x128xf32>
    %240 = math.tanh %239 : vector<8x128xf32>
    %cst_77 = arith.constant 1.000000e+00 : f32
    %241 = vector.broadcast %cst_77 : f32 to vector<8x128xf32>
    %242 = arith.addf %240, %241 : vector<8x128xf32>
    %cst_78 = arith.constant 5.000000e-01 : f32
    %243 = vector.broadcast %cst_78 : f32 to vector<8x128xf32>
    %244 = arith.mulf %243, %242 : vector<8x128xf32>
    %245 = vector.extract_strided_slice %223 {offsets = [0, 256], sizes = [8, 128], strides = [1, 1]} : vector<8x384xf32> to vector<8x128xf32>
    %246 = vector.extract_strided_slice %224 {offsets = [0, 256], sizes = [8, 128], strides = [1, 1]} : vector<8x384xf32> to vector<8x128xf32>
    %247 = arith.mulf %234, %246 : vector<8x128xf32>
    %248 = arith.addf %245, %247 : vector<8x128xf32>
    %249 = math.tanh %248 : vector<8x128xf32>
    %250 = arith.subf %216, %249 : vector<8x128xf32>
    %251 = arith.mulf %244, %250 : vector<8x128xf32>
    %252 = arith.addf %249, %251 : vector<8x128xf32>
    %253 = arith.index_cast %c6_i32 : i32 to index
    %c0_79 = arith.constant 0 : index
    %c0_80 = arith.constant 0 : index
    %254 = vector.load %arg4[%253, %c0_79, %c0_80] : memref<8x8x128xf32, #tpu.memory_space<vmem>>, vector<1x8x128xf32>
    %255 = vector.shape_cast %254 : vector<1x8x128xf32> to vector<8x128xf32>
    %256 = vector.shape_cast %252 : vector<8x128xf32> to vector<1x8x128xf32>
    tpu.vector_store %arg4[%253, %c0_79, %c0_80], %256 {strides = array<i32>} : memref<8x8x128xf32, #tpu.memory_space<vmem>>, vector<1x8x128xf32>,
    %c7_i32 = arith.constant 7 : i32
    %257 = arith.index_cast %c7_i32 : i32 to index
    %c0_81 = arith.constant 0 : index
    %c0_82 = arith.constant 0 : index
    %258 = vector.load %arg2[%257, %c0_81, %c0_82] : memref<8x8x384xf32, #tpu.memory_space<vmem>>, vector<1x8x384xf32>
    %259 = vector.shape_cast %258 : vector<1x8x384xf32> to vector<8x384xf32>
    %cst_83 = arith.constant dense<0.000000e+00> : vector<8x384xf32>
    %260 = tpu.matmul %252, %3, %cst_83 {dimension_numbers = #tpu.dot_dimension_numbers<[1], [0], [0], [1], [0, 0, 1, 1], [], []>} : vector<8x128xf32>, vector<128x384xf32>, vector<8x384xf32> -> vector<8x384xf32>
    %261 = vector.extract_strided_slice %259 {offsets = [0, 0], sizes = [8, 128], strides = [1, 1]} : vector<8x384xf32> to vector<8x128xf32>
    %262 = vector.extract_strided_slice %260 {offsets = [0, 0], sizes = [8, 128], strides = [1, 1]} : vector<8x384xf32> to vector<8x128xf32>
    %263 = arith.addf %261, %262 : vector<8x128xf32>
    %cst_84 = arith.constant 5.000000e-01 : f32
    %264 = vector.broadcast %cst_84 : f32 to vector<8x128xf32>
    %265 = arith.mulf %264, %263 : vector<8x128xf32>
    %266 = math.tanh %265 : vector<8x128xf32>
    %cst_85 = arith.constant 1.000000e+00 : f32
    %267 = vector.broadcast %cst_85 : f32 to vector<8x128xf32>
    %268 = arith.addf %266, %267 : vector<8x128xf32>
    %cst_86 = arith.constant 5.000000e-01 : f32
    %269 = vector.broadcast %cst_86 : f32 to vector<8x128xf32>
    %270 = arith.mulf %269, %268 : vector<8x128xf32>
    %271 = vector.extract_strided_slice %259 {offsets = [0, 128], sizes = [8, 128], strides = [1, 1]} : vector<8x384xf32> to vector<8x128xf32>
    %272 = vector.extract_strided_slice %260 {offsets = [0, 128], sizes = [8, 128], strides = [1, 1]} : vector<8x384xf32> to vector<8x128xf32>
    %273 = arith.addf %271, %272 : vector<8x128xf32>
    %cst_87 = arith.constant 5.000000e-01 : f32
    %274 = vector.broadcast %cst_87 : f32 to vector<8x128xf32>
    %275 = arith.mulf %274, %273 : vector<8x128xf32>
    %276 = math.tanh %275 : vector<8x128xf32>
    %cst_88 = arith.constant 1.000000e+00 : f32
    %277 = vector.broadcast %cst_88 : f32 to vector<8x128xf32>
    %278 = arith.addf %276, %277 : vector<8x128xf32>
    %cst_89 = arith.constant 5.000000e-01 : f32
    %279 = vector.broadcast %cst_89 : f32 to vector<8x128xf32>
    %280 = arith.mulf %279, %278 : vector<8x128xf32>
    %281 = vector.extract_strided_slice %259 {offsets = [0, 256], sizes = [8, 128], strides = [1, 1]} : vector<8x384xf32> to vector<8x128xf32>
    %282 = vector.extract_strided_slice %260 {offsets = [0, 256], sizes = [8, 128], strides = [1, 1]} : vector<8x384xf32> to vector<8x128xf32>
    %283 = arith.mulf %270, %282 : vector<8x128xf32>
    %284 = arith.addf %281, %283 : vector<8x128xf32>
    %285 = math.tanh %284 : vector<8x128xf32>
    %286 = arith.subf %252, %285 : vector<8x128xf32>
    %287 = arith.mulf %280, %286 : vector<8x128xf32>
    %288 = arith.addf %285, %287 : vector<8x128xf32>
    %289 = arith.index_cast %c7_i32 : i32 to index
    %c0_90 = arith.constant 0 : index
    %c0_91 = arith.constant 0 : index
    %290 = vector.load %arg4[%289, %c0_90, %c0_91] : memref<8x8x128xf32, #tpu.memory_space<vmem>>, vector<1x8x128xf32>
    %291 = vector.shape_cast %290 : vector<1x8x128xf32> to vector<8x128xf32>
    %292 = vector.shape_cast %288 : vector<8x128xf32> to vector<1x8x128xf32>
    tpu.vector_store %arg4[%289, %c0_90, %c0_91], %292 {strides = array<i32>} : memref<8x8x128xf32, #tpu.memory_space<vmem>>, vector<1x8x128xf32>,
    %c8_i32 = arith.constant 8 : i32
    %c0_92 = arith.constant 0 : index
    %c0_93 = arith.constant 0 : index
    %293 = vector.load %arg5[%c0_92, %c0_93] : memref<8x128xf32, #tpu.memory_space<vmem>>, vector<8x128xf32>
    tpu.vector_store %arg5[%c0_92, %c0_93], %288 {strides = array<i32>} : memref<8x128xf32, #tpu.memory_space<vmem>>, vector<8x128xf32>,
    return
  }
  func.func @transform_0(%arg0: i32, %arg1: i32) -> (i32, i32, i32) {
    %c0_i32 = arith.constant 0 : i32
    %c0_i32_0 = arith.constant 0 : i32
    return %arg1, %arg0, %c0_i32 : i32, i32, i32
  }
  func.func @transform_1(%arg0: i32, %arg1: i32) -> (i32, i32) {
    %c0_i32 = arith.constant 0 : i32
    %c0_i32_0 = arith.constant 0 : i32
    %c0_i32_1 = arith.constant 0 : i32
    return %c0_i32, %c0_i32_0 : i32, i32
  }
  func.func @transform_2(%arg0: i32, %arg1: i32) -> (i32, i32, i32) {
    %c0_i32 = arith.constant 0 : i32
    %c0_i32_0 = arith.constant 0 : i32
    return %arg1, %arg0, %c0_i32 : i32, i32, i32
  }
}

</mosaic_0001>

<bundles_post_ra>
// kernel: gru_model_forward.5
= control target key start
LH: loop header
LB: loop body
LE: loop exit
PB: predicated region body
PF: predicated region fallthrough
CT: control target
= control target key end

     0   :  { %s314_s0 = inlined_call_operand.vmem [shape: f32[16,128], index: 0, kind: input, shape index: {}]   ;;  %s315_s1 = inlined_call_operand.vmem [shape: f32[128,128], index: 1, kind: input, shape index: {}]   ;;  %s316_s2 = inlined_call_operand.vmem [shape: f32[1,128], index: 2, kind: input, shape index: {}]   ;;  %s317_s3 = inlined_call_operand.hbm [shape: f32[16,128], index: 3, kind: output, shape index: {}]  }
   0x1   :  { %v40_v0 = vld [vmem:[%s315_s1 + $0x78] sm:$0xff]  ;;  %v39_v1 = vld [vmem:[%s315_s1 + $0x70] sm:$0xff]  ;;  %v38_v2 = vld [vmem:[%s315_s1 + $0x68] sm:$0xff] }
   0x2   :  { %171 = vmatprep.subr.mxu0 %v40_v0  ;;  %v37_v3 = vld [vmem:[%s315_s1 + $0x60] sm:$0xff]  ;;  %v36_v5 = vld [vmem:[%s315_s1 + $0x58] sm:$0xff] }
   0x3   :  { %172 = vmatpush3.msra.mxu0 %v40_v0  ;;  %v23_v4 = vld [vmem:[%s314_s0] sm:$0xff] }
   0x4   :  { %173 = vmatprep.subr.mxu0 %v39_v1  ;;  %203 = vmatprep.mubr.f32.mxu0 %v23_v4 }
   0x5   :  { %174 = vmatpush3.msra.mxu0 %v39_v1 }
   0x6   :  { %175 = vmatprep.subr.mxu0 %v38_v2 }
   0x7   :  { %176 = vmatpush3.msra.mxu0 %v38_v2 }
   0x8   :  { %8 = vsyncpa [#allocation4], 0  ;;  %177 = vmatprep.subr.mxu0 %v37_v3  ;;  %v35_v6 = vld [vmem:[%s315_s1 + $0x50] sm:$0xff]  ;;  %v34_v7 = vld [vmem:[%s315_s1 + $0x48] sm:$0xff]  ;;  %s231_s23 = smov [#allocation3]  }
   0x9   :  { %178 = vmatpush3.msra.mxu0 %v37_v3  ;;  %v33_v8 = vld [vmem:[%s315_s1 + $0x40] sm:$0xff]  ;;  %v32_v9 = vld [vmem:[%s315_s1 + $0x38] sm:$0xff]  ;;  %v31_v10 = vld [vmem:[%s315_s1 + $0x30] sm:$0xff]  ;;  %s141_s24 = sshll.u32 %s231_s23, 4  ;;  %s142_s24 = int_to_ptr.vmem [resolvable:$true] %s141_s24 }
   0xa   :  { %179 = vmatprep.subr.mxu0 %v36_v5  ;;  %v30_v11 = vld [vmem:[%s315_s1 + $0x28] sm:$0xff]  ;;  %v29_v12 = vld [vmem:[%s315_s1 + $0x20] sm:$0xff]  ;;  %v28_v13 = vld [vmem:[%s315_s1 + $0x18] sm:$0xff]  ;;  %p214_p1 = scmp.lt.s32.totalorder %s142_s24, %s142_s24 }
   0xb   :  { %180 = vmatpush3.msra.mxu0 %v36_v5  ;;  %v27_v14 = vld [vmem:[%s315_s1 + $0x10] sm:$0xff]  ;;  %v26_v15 = vld [vmem:[%s315_s1 + $0x8] sm:$0xff]  ;;  %v25_v16 = vld [vmem:[%s315_s1] sm:$0xff]  ;;  %s209_s1 = scalar_lea.vmem %s142_s24, 256 }
   0xc   :  { %181 = vmatprep.subr.mxu0 %v35_v6  ;;  %v24_v17 = vld [vmem:[%s314_s0 + $0x8] sm:$0xff]  ;;  %v152_v18 = vld [vmem:[%s316_s2] ss:$0 sm:$0xff]  ;;  %p210_p0 = scmp.ne.s32.totalorder %s142_s24, %s209_s1  ;;  %p215_p2 = scmp.lt.s32.totalorder %s209_s1, %s209_s1 }
   0xd   :  { %182 = vmatpush3.msra.mxu0 %v35_v6 }
   0xe   :  { %183 = vmatprep.subr.mxu0 %v34_v7  ;;  %p216_p3 = por %p215_p2, %p214_p1 }
   0xf   :  { %184 = vmatpush3.msra.mxu0 %v34_v7 }
  0x10   :  { %185 = vmatprep.subr.mxu0 %v33_v8  ;;  %p217_p4 = pnand %p216_p3, %p210_p0 }
  0x11   :  { %186 = vmatpush3.msra.mxu0 %v33_v8 }
  0x12   :  { %187 = vmatprep.subr.mxu0 %v32_v9 }
  0x13   :  { %188 = vmatpush3.msra.mxu0 %v32_v9 }
  0x14   :  { %189 = vmatprep.subr.mxu0 %v31_v10 }
  0x15   :  { %190 = vmatpush3.msra.mxu0 %v31_v10 }
  0x16   :  { %191 = vmatprep.subr.mxu0 %v30_v11 }
  0x17   :  { %192 = vmatpush3.msra.mxu0 %v30_v11 }
  0x18   :  { %193 = vmatprep.subr.mxu0 %v29_v12 }
  0x19   :  { %194 = vmatpush3.msra.mxu0 %v29_v12 }
  0x1a   :  { %195 = vmatprep.subr.mxu0 %v28_v13 }
  0x1b   :  { %196 = vmatpush3.msra.mxu0 %v28_v13 }
  0x1c   :  { %197 = vmatprep.subr.mxu0 %v27_v14 }
  0x1d   :  { %198 = vmatpush3.msra.mxu0 %v27_v14 }
  0x1e   :  { %199 = vmatprep.subr.mxu0 %v26_v15 }
  0x1f   :  { %200 = vmatpush3.msra.mxu0 %v26_v15 }
  0x20   :  { %201 = vmatprep.subr.mxu0 %v25_v16 }
  0x21   :  { %202 = vmatpush3.msra.mxu0 %v25_v16 }
  0x22   :  { %204 = vmatmul.mubr.f32.vlgmr.msra.gmra.mxu0 %v24_v17 }
  0xe2   :  { %v205_v19 = vpop.f32.mrf.mxu0 }
  0xe3   :  { %v133_v20 = vadd.f32 %v205_v19, %v152_v18 }
  0xe4   :  { %v107_v21 = vpop.f32.mrf.mxu0 }
  0xe5   :  { %135 = vst [vmem:[#allocation3 + $0x8] sm:$0xff] %v133_v20  ;;  %v132_v22 = vadd.f32 %v152_v18, %v107_v21 }
  0xe7   :  { %134 = vst [vmem:[#allocation3] sm:$0xff] %v132_v22 }
  0xe8   :  { %220 = shalt.err (!%p217_p4)
}
  0xe9   :  { %s232_s0 = smov 128   ;;  %s233_s25 = smov 8  }
  0xea   :  { %147 = dma.vmem_to_hbm [thread:$0]  %s142_s24, 256, %s317_s3, [#allocation4], %s232_s0, %s232_s0, %s233_s25  }
  0xeb   :  { %229 = dma.done.wait [#allocation4], 256  }
  0xec   :  { %230 = vsyncadd [#allocation4], 4294967040 }
  0xed   :  { %151 = vsyncpa [#allocation4], 1 }

// kernel: gru_model_forward.3
= control target key start
LH: loop header
LB: loop body
LE: loop exit
PB: predicated region body
PF: predicated region fallthrough
CT: control target
= control target key end

     0   :  { %8 = vsyncpa [#allocation4], 0  ;;  %s593_s12 = smov [#allocation3]   ;;  %s747_s0 = inlined_call_operand.vmem [shape: f32[64,128], index: 0, kind: input, shape index: {}]   ;;  %s748_s1 = inlined_call_operand.hbm [shape: f32[128,384], index: 1, kind: input, shape index: {}]   ;;  %s749_s2 = inlined_call_operand.vmem [shape: f32[1,384], index: 2, kind: input, shape index: {}]   ;;  %s750_s3 = inlined_call_operand.vmem [shape: f32[64,384], index: 3, kind: output, shape index: {}]  }
   0x1   :  { %s16_s13 = sshll.u32 %s593_s12, 4  ;;  %s17_s13 = int_to_ptr.vmem [resolvable:$true] %s16_s13 }
   0x2   :  { %s579_s14 = scalar_lea.vmem %s17_s13, 6144  ;;  %p584_p1 = scmp.lt.s32.totalorder %s17_s13, %s17_s13 }
   0x3   :  { %p580_p0 = scmp.ne.s32.totalorder %s17_s13, %s579_s14  ;;  %p585_p2 = scmp.lt.s32.totalorder %s579_s14, %s579_s14 }
   0x5   :  { %p586_p3 = por %p585_p2, %p584_p1 }
   0x7   :  { %p587_p4 = pnand %p586_p3, %p580_p0 }
   0x9   :  { %590 = shalt.err (!%p587_p4)
}
   0xa   :  { %s594_s15 = smov 384   ;;  %s595_s16 = smov 24  }
   0xb   :  { %22 = dma.hbm_to_vmem [thread:$0]  %s748_s1, 6144, %s17_s13, [#allocation4], %s594_s15, %s594_s15, %s595_s16  }
   0xc   :  { %591 = dma.done.wait [#allocation4], 6144  }
   0xd   :  { %592 = vsyncadd [#allocation4], 4294961152  ;;  %v596_v0 = vmov 0.0   ;;  %v134_v1 = vld [vmem:[#allocation3 + $0x170] sm:$0xff]  ;;  %v133_v2 = vld [vmem:[#allocation3 + $0x168] sm:$0xff]  ;;  %v431_v57 = vlaneseq }
   0xe   :  { %200 = vmatprep.mubr.f32.mxu0 %v596_v0  ;;  %v131_v3 = vld [vmem:[#allocation3 + $0x158] sm:$0xff]  ;;  %136 = vmatprep.subr.mxu0 %v134_v1  ;;  %v130_v4 = vld [vmem:[#allocation3 + $0x150] sm:$0xff]  ;;  %v128_v5 = vld [vmem:[#allocation3 + $0x140] sm:$0xff] }
   0xf   :  { %137 = vmatpush1.msra.mxu0 %v133_v2  ;;  %v127_v6 = vld [vmem:[#allocation3 + $0x138] sm:$0xff]  ;;  %v125_v7 = vld [vmem:[#allocation3 + $0x128] sm:$0xff]  ;;  %v124_v8 = vld [vmem:[#allocation3 + $0x120] sm:$0xff]  ;;  %v432_v58 = vshrl.u32 %v431_v57, 7 }
  0x10   :  { %138 = vmatprep.subr.mxu0 %v131_v3  ;;  %v135_v9 = vld [vmem:[#allocation3 + $0x178] sm:$0xff]  ;;  %v122_v10 = vld [vmem:[#allocation3 + $0x110] sm:$0xff]  ;;  %v132_v11 = vld [vmem:[#allocation3 + $0x160] sm:$0xff] }
  0x11   :  { %139 = vmatpush1.msra.mxu0 %v130_v4  ;;  %523 = vmatprep.subr.mxu1 %v135_v9  ;;  %v121_v12 = vld [vmem:[#allocation3 + $0x108] sm:$0xff]  ;;  %v119_v14 = vld [vmem:[#allocation3 + $0xf8] sm:$0xff]  ;;  %v118_v15 = vld [vmem:[#allocation3 + $0xf0] sm:$0xff]  ;;  %v433_v59 = vsub.s32 0, %v432_v58  ;;  %v437_v61 = vsub.s32 1, %v432_v58  ;;  %v441_v63 = vsub.s32 2, %v432_v58 }
  0x12   :  { %140 = vmatprep.subr.mxu0 %v128_v5  ;;  %524 = vmatpush3.msra.mxu1 %v135_v9  ;;  %v129_v13 = vld [vmem:[#allocation3 + $0x148] sm:$0xff]  ;;  %v126_v16 = vld [vmem:[#allocation3 + $0x130] sm:$0xff]  ;;  %v116_v17 = vld [vmem:[#allocation3 + $0xe0] sm:$0xff] }
  0x13   :  { %141 = vmatpush1.msra.mxu0 %v127_v6  ;;  %525 = vmatprep.subr.mxu1 %v132_v11  ;;  %v115_v18 = vld [vmem:[#allocation3 + $0xd8] sm:$0xff]  ;;  %v113_v20 = vld [vmem:[#allocation3 + $0xc8] sm:$0xff]  ;;  %v112_v21 = vld [vmem:[#allocation3 + $0xc0] sm:$0xff] }
  0x14   :  { %142 = vmatprep.subr.mxu0 %v125_v7  ;;  %526 = vmatpush3.msra.mxu1 %v132_v11  ;;  %v123_v19 = vld [vmem:[#allocation3 + $0x118] sm:$0xff]  ;;  %v120_v22 = vld [vmem:[#allocation3 + $0x100] sm:$0xff]  ;;  %v110_v23 = vld [vmem:[#allocation3 + $0xb0] sm:$0xff] }
  0x15   :  { %143 = vmatpush1.msra.mxu0 %v124_v8  ;;  %527 = vmatprep.subr.mxu1 %v129_v13  ;;  %v109_v24 = vld [vmem:[#allocation3 + $0xa8] sm:$0xff]  ;;  %v107_v26 = vld [vmem:[#allocation3 + $0x98] sm:$0xff]  ;;  %v106_v27 = vld [vmem:[#allocation3 + $0x90] sm:$0xff] }
  0x16   :  { %144 = vmatprep.subr.mxu0 %v122_v10  ;;  %528 = vmatpush3.msra.mxu1 %v129_v13  ;;  %v117_v25 = vld [vmem:[#allocation3 + $0xe8] sm:$0xff]  ;;  %v114_v28 = vld [vmem:[#allocation3 + $0xd0] sm:$0xff]  ;;  %v104_v29 = vld [vmem:[#allocation3 + $0x80] sm:$0xff] }
  0x17   :  { %145 = vmatpush1.msra.mxu0 %v121_v12  ;;  %529 = vmatprep.subr.mxu1 %v126_v16  ;;  %v103_v30 = vld [vmem:[#allocation3 + $0x78] sm:$0xff]  ;;  %v101_v32 = vld [vmem:[#allocation3 + $0x68] sm:$0xff]  ;;  %v100_v33 = vld [vmem:[#allocation3 + $0x60] sm:$0xff] }
  0x18   :  { %146 = vmatprep.subr.mxu0 %v119_v14  ;;  %530 = vmatpush3.msra.mxu1 %v126_v16  ;;  %v111_v31 = vld [vmem:[#allocation3 + $0xb8] sm:$0xff]  ;;  %v108_v34 = vld [vmem:[#allocation3 + $0xa0] sm:$0xff]  ;;  %v98_v35 = vld [vmem:[#allocation3 + $0x50] sm:$0xff] }
  0x19   :  { %147 = vmatpush1.msra.mxu0 %v118_v15  ;;  %531 = vmatprep.subr.mxu1 %v123_v19  ;;  %v97_v36 = vld [vmem:[#allocation3 + $0x48] sm:$0xff]  ;;  %v95_v38 = vld [vmem:[#allocation3 + $0x38] sm:$0xff]  ;;  %v94_v39 = vld [vmem:[#allocation3 + $0x30] sm:$0xff] }
  0x1a   :  { %148 = vmatprep.subr.mxu0 %v116_v17  ;;  %532 = vmatpush3.msra.mxu1 %v123_v19  ;;  %v105_v37 = vld [vmem:[#allocation3 + $0x88] sm:$0xff]  ;;  %v102_v40 = vld [vmem:[#allocation3 + $0x70] sm:$0xff]  ;;  %v92_v41 = vld [vmem:[#allocation3 + $0x20] sm:$0xff] }
  0x1b   :  { %149 = vmatpush1.msra.mxu0 %v115_v18  ;;  %533 = vmatprep.subr.mxu1 %v120_v22  ;;  %v91_v42 = vld [vmem:[#allocation3 + $0x18] sm:$0xff]  ;;  %v89_v44 = vld [vmem:[#allocation3 + $0x8] sm:$0xff]  ;;  %v88_v45 = vld [vmem:[#allocation3] sm:$0xff] }
  0x1c   :  { %150 = vmatprep.subr.mxu0 %v113_v20  ;;  %534 = vmatpush3.msra.mxu1 %v120_v22  ;;  %v99_v43 = vld [vmem:[#allocation3 + $0x58] sm:$0xff]  ;;  %v96_v46 = vld [vmem:[#allocation3 + $0x40] sm:$0xff]  ;;  %v93_v48 = vld [vmem:[#allocation3 + $0x28] sm:$0xff] }
  0x1d   :  { %151 = vmatpush1.msra.mxu0 %v112_v21  ;;  %535 = vmatprep.subr.mxu1 %v117_v25  ;;  %v80_v47 = vld [vmem:[%s747_s0] sm:$0xff]  ;;  %v90_v49 = vld [vmem:[#allocation3 + $0x10] sm:$0xff]  ;;  %v81_v50 = vld [vmem:[%s747_s0 + $0x8] sm:$0xff] }
  0x1e   :  { %152 = vmatprep.subr.mxu0 %v110_v23  ;;  %536 = vmatpush3.msra.mxu1 %v117_v25  ;;  %v82_v51 = vld [vmem:[%s747_s0 + $0x10] sm:$0xff]  ;;  %v83_v52 = vld [vmem:[%s747_s0 + $0x18] sm:$0xff]  ;;  %v84_v53 = vld [vmem:[%s747_s0 + $0x20] sm:$0xff] }
  0x1f   :  { %153 = vmatpush1.msra.mxu0 %v109_v24  ;;  %537 = vmatprep.subr.mxu1 %v114_v28  ;;  %v86_v54 = vld [vmem:[%s747_s0 + $0x30] sm:$0xff]  ;;  %v85_v55 = vld [vmem:[%s747_s0 + $0x28] sm:$0xff]  ;;  %v87_v56 = vld [vmem:[%s747_s0 + $0x38] sm:$0xff] }
  0x20   :  { %154 = vmatprep.subr.mxu0 %v107_v26  ;;  %538 = vmatpush3.msra.mxu1 %v114_v28  ;;  %v429_v60 = vld [vmem:[%s749_s2] sm:$0x7] }
  0x21   :  { %155 = vmatpush1.msra.mxu0 %v106_v27  ;;  %539 = vmatprep.subr.mxu1 %v111_v31  ;;  %v655_v62 = vrot.slane %v429_v60, %v433_v59  ;;  %v657_v1 = vrot.slane %v429_v60, %v437_v61  ;;  %v442_v5 = vrot.slane %v429_v60, %v441_v63 }
  0x22   :  { %156 = vmatprep.subr.mxu0 %v104_v29  ;;  %540 = vmatpush3.msra.mxu1 %v111_v31 }
  0x23   :  { %157 = vmatpush1.msra.mxu0 %v103_v30  ;;  %541 = vmatprep.subr.mxu1 %v108_v34 }
  0x24   :  { %158 = vmatprep.subr.mxu0 %v101_v32  ;;  %542 = vmatpush3.msra.mxu1 %v108_v34 }
  0x25   :  { %159 = vmatpush1.msra.mxu0 %v100_v33  ;;  %543 = vmatprep.subr.mxu1 %v105_v37 }
  0x26   :  { %160 = vmatprep.subr.mxu0 %v98_v35  ;;  %544 = vmatpush3.msra.mxu1 %v105_v37 }
  0x27   :  { %161 = vmatpush1.msra.mxu0 %v97_v36  ;;  %545 = vmatprep.subr.mxu1 %v102_v40 }
  0x28   :  { %162 = vmatprep.subr.mxu0 %v95_v38  ;;  %546 = vmatpush3.msra.mxu1 %v102_v40 }
  0x29   :  { %163 = vmatpush1.msra.mxu0 %v94_v39  ;;  %547 = vmatprep.subr.mxu1 %v99_v43 }
  0x2a   :  { %164 = vmatprep.subr.mxu0 %v92_v41  ;;  %548 = vmatpush3.msra.mxu1 %v99_v43 }
  0x2b   :  { %165 = vmatpush1.msra.mxu0 %v91_v42  ;;  %549 = vmatprep.subr.mxu1 %v96_v46 }
  0x2c   :  { %166 = vmatprep.subr.mxu0 %v89_v44  ;;  %550 = vmatpush3.msra.mxu1 %v96_v46 }
  0x2d   :  { %167 = vmatpush1.msra.mxu0 %v88_v45  ;;  %551 = vmatprep.subr.mxu1 %v93_v48 }
  0x2e   :  { %201 = vmatmul.mubr.f32.vlgmr.msra.gmra.mxu0 %v80_v47  ;;  %552 = vmatpush3.msra.mxu1 %v93_v48 }
  0x2f   :  { %206 = vmatprep.mubr.f32.mxu0 %v596_v0  ;;  %555 = vmatprep.mubr.f32.mxu1 %v80_v47 }
  0x30   :  { %553 = vmatprep.subr.mxu1 %v90_v49 }
  0x31   :  { %554 = vmatpush3.msra.mxu1 %v90_v49 }
  0x32   :  { %207 = vmatmul.mubr.f32.gmra.mxu0 %v81_v50  ;;  %556 = vmatmul.mubr.f32.vlgmr.msra.gmra.mxu1 %v81_v50 }
  0x33   :  { %212 = vmatprep.mubr.f32.mxu0 %v596_v0  ;;  %558 = vmatprep.mubr.f32.mxu1 %v82_v51 }
  0x36   :  { %213 = vmatmul.mubr.f32.gmra.mxu0 %v82_v51  ;;  %559 = vmatmul.mubr.f32.gmra.mxu1 %v83_v52 }
  0x37   :  { %218 = vmatprep.mubr.f32.mxu0 %v596_v0  ;;  %561 = vmatprep.mubr.f32.mxu1 %v84_v53 }
  0x3a   :  { %219 = vmatmul.mubr.f32.gmra.mxu0 %v83_v52  ;;  %562 = vmatmul.mubr.f32.gmra.mxu1 %v85_v55 }
  0x3b   :  { %224 = vmatprep.mubr.f32.mxu0 %v596_v0  ;;  %564 = vmatprep.mubr.f32.mxu1 %v86_v54 }
  0x3e   :  { %225 = vmatmul.mubr.f32.gmra.mxu0 %v84_v53  ;;  %565 = vmatmul.mubr.f32.gmra.mxu1 %v87_v56 }
  0x3f   :  { %230 = vmatprep.mubr.f32.mxu0 %v596_v0 }
  0x42   :  { %231 = vmatmul.mubr.f32.gmra.mxu0 %v85_v55 }
  0x43   :  { %236 = vmatprep.mubr.f32.mxu0 %v596_v0 }
  0x46   :  { %237 = vmatmul.mubr.f32.gmra.mxu0 %v86_v54 }
  0x47   :  { %242 = vmatprep.mubr.f32.mxu0 %v596_v0 }
  0x4a   :  { %243 = vmatmul.mubr.f32.gmra.mxu0 %v87_v56 }
  0xee   :  { %v202_v2 = vpop.f32.mrf.mxu0 }
  0xef   :  { %v446_v3 = vadd.f32 %v655_v62, %v202_v2 }
  0xf0   :  { %v204_v4 = vpop.f32.mrf.mxu0 }
  0xf1   :  { %470 = vst [vmem:[%s750_s3] sm:$0xff] %v446_v3  ;;  %v447_v0 = vadd.f32 %v657_v1, %v204_v4 }
  0xf2   :  { %v208_v6 = vpop.f32.mrf.mxu0  ;;  %v557_v8 = vpop.f32.mrf.mxu1 }
  0xf3   :  { %471 = vst [vmem:[%s750_s3 + $0x8] sm:$0xff] %v447_v0  ;;  %v449_v7 = vadd.f32 %v655_v62, %v208_v6  ;;  %v451_v10 = vadd.f32 %v557_v8, %v442_v5 }
  0xf4   :  { %v210_v9 = vpop.f32.mrf.mxu0  ;;  %v315_v12 = vpop.f32.mrf.mxu1 }
  0xf5   :  { %473 = vst [vmem:[%s750_s3 + $0x18] sm:$0xff] %v449_v7  ;;  %v450_v11 = vadd.f32 %v657_v1, %v210_v9  ;;  %475 = vst [vmem:[%s750_s3 + $0x28] sm:$0xff] %v451_v10  ;;  %v448_v14 = vadd.f32 %v442_v5, %v315_v12 }
  0xf6   :  { %v214_v13 = vpop.f32.mrf.mxu0  ;;  %v560_v16 = vpop.f32.mrf.mxu1 }
  0xf7   :  { %474 = vst [vmem:[%s750_s3 + $0x20] sm:$0xff] %v450_v11  ;;  %v452_v15 = vadd.f32 %v655_v62, %v214_v13  ;;  %472 = vst [vmem:[%s750_s3 + $0x10] sm:$0xff] %v448_v14  ;;  %v457_v18 = vadd.f32 %v560_v16, %v442_v5 }
  0xf8   :  { %v216_v17 = vpop.f32.mrf.mxu0  ;;  %v325_v20 = vpop.f32.mrf.mxu1 }
  0xf9   :  { %476 = vst [vmem:[%s750_s3 + $0x30] sm:$0xff] %v452_v15  ;;  %v453_v19 = vadd.f32 %v657_v1, %v216_v17  ;;  %481 = vst [vmem:[%s750_s3 + $0x58] sm:$0xff] %v457_v18  ;;  %v454_v22 = vadd.f32 %v442_v5, %v325_v20 }
  0xfa   :  { %v220_v21 = vpop.f32.mrf.mxu0  ;;  %v563_v24 = vpop.f32.mrf.mxu1 }
  0xfb   :  { %477 = vst [vmem:[%s750_s3 + $0x38] sm:$0xff] %v453_v19  ;;  %v455_v23 = vadd.f32 %v655_v62, %v220_v21  ;;  %478 = vst [vmem:[%s750_s3 + $0x40] sm:$0xff] %v454_v22  ;;  %v463_v26 = vadd.f32 %v563_v24, %v442_v5 }
  0xfc   :  { %v222_v25 = vpop.f32.mrf.mxu0  ;;  %v335_v28 = vpop.f32.mrf.mxu1 }
  0xfd   :  { %479 = vst [vmem:[%s750_s3 + $0x48] sm:$0xff] %v455_v23  ;;  %v456_v27 = vadd.f32 %v657_v1, %v222_v25  ;;  %487 = vst [vmem:[%s750_s3 + $0x88] sm:$0xff] %v463_v26  ;;  %v460_v30 = vadd.f32 %v442_v5, %v335_v28 }
  0xfe   :  { %v226_v29 = vpop.f32.mrf.mxu0  ;;  %v566_v32 = vpop.f32.mrf.mxu1 }
  0xff   :  { %480 = vst [vmem:[%s750_s3 + $0x50] sm:$0xff] %v456_v27  ;;  %v458_v31 = vadd.f32 %v655_v62, %v226_v29  ;;  %484 = vst [vmem:[%s750_s3 + $0x70] sm:$0xff] %v460_v30  ;;  %v469_v34 = vadd.f32 %v566_v32, %v442_v5 }
 0x100   :  { %v228_v33 = vpop.f32.mrf.mxu0  ;;  %v345_v36 = vpop.f32.mrf.mxu1 }
 0x101   :  { %482 = vst [vmem:[%s750_s3 + $0x60] sm:$0xff] %v458_v31  ;;  %v459_v35 = vadd.f32 %v657_v1, %v228_v33  ;;  %493 = vst [vmem:[%s750_s3 + $0xb8] sm:$0xff] %v469_v34  ;;  %v466_v38 = vadd.f32 %v442_v5, %v345_v36 }
 0x102   :  { %v232_v37 = vpop.f32.mrf.mxu0 }
 0x103   :  { %483 = vst [vmem:[%s750_s3 + $0x68] sm:$0xff] %v459_v35  ;;  %v461_v39 = vadd.f32 %v655_v62, %v232_v37  ;;  %490 = vst [vmem:[%s750_s3 + $0xa0] sm:$0xff] %v466_v38 }
 0x104   :  { %v234_v40 = vpop.f32.mrf.mxu0 }
 0x105   :  { %485 = vst [vmem:[%s750_s3 + $0x78] sm:$0xff] %v461_v39  ;;  %v462_v41 = vadd.f32 %v657_v1, %v234_v40 }
 0x106   :  { %v238_v42 = vpop.f32.mrf.mxu0 }
 0x107   :  { %486 = vst [vmem:[%s750_s3 + $0x80] sm:$0xff] %v462_v41  ;;  %v464_v43 = vadd.f32 %v655_v62, %v238_v42 }
 0x108   :  { %v240_v44 = vpop.f32.mrf.mxu0 }
 0x109   :  { %488 = vst [vmem:[%s750_s3 + $0x90] sm:$0xff] %v464_v43  ;;  %v465_v45 = vadd.f32 %v657_v1, %v240_v44 }
 0x10a   :  { %v244_v46 = vpop.f32.mrf.mxu0 }
 0x10b   :  { %489 = vst [vmem:[%s750_s3 + $0x98] sm:$0xff] %v465_v45  ;;  %v467_v47 = vadd.f32 %v655_v62, %v244_v46 }
 0x10c   :  { %v246_v48 = vpop.f32.mrf.mxu0 }
 0x10d   :  { %491 = vst [vmem:[%s750_s3 + $0xa8] sm:$0xff] %v467_v47  ;;  %v468_v49 = vadd.f32 %v657_v1, %v246_v48 }
 0x10f   :  { %492 = vst [vmem:[%s750_s3 + $0xb0] sm:$0xff] %v468_v49 }
 0x110   :  { %498 = vsyncpa [#allocation4], 1 }

// kernel: gru_model_forward.4
= control target key start
LH: loop header
LB: loop body
LE: loop exit
PB: predicated region body
PF: predicated region fallthrough
CT: control target
= control target key end

     0   :  { %v3084_v3 = vmov 0.0   ;;  %vm1915_vm0 = vmmov 0   ;;  %s3081_s1 = inlined_call_operand.vmem [shape: f32[128,384], index: 1, kind: input, shape index: {}]   ;;  %s3082_s0 = inlined_call_operand.vmem [shape: f32[8,8,384], index: 0, kind: input, shape index: {}]   ;;  %s3083_s2 = inlined_call_operand.vmem [shape: f32[8,8,128], index: 2, kind: output, shape index: {}]  }
   0x1   :  { %v1934_v0 = vld [vmem:[%s3081_s1 + $0x170] sm:$0xff]  ;;  %v1939_v1 = vld [vmem:[%s3081_s1 + $0x168] sm:$0xff]  ;;  %v1944_v2 = vld [vmem:[%s3081_s1 + $0x158] sm:$0xff]  ;;  %1536 = vmatprep.subr.mxu1 %v3084_v3  ;;  %132 = vmatprep.mubr.f32.mxu0 %v3084_v3 }
   0x2   :  { %3094 = vst [vmem:[#allocation3_spill] sm:$0xff] %v1934_v0  ;;  %68 = vmatprep.subr.mxu0 %v1934_v0  ;;  %v1952_v4 = vld [vmem:[%s3081_s1 + $0x150] sm:$0xff]  ;;  %1568 = vmatprep.mubr.msk.f32.mxu1 %vm1915_vm0, %v3084_v3  ;;  %v1960_v5 = vld [vmem:[%s3081_s1 + $0x140] sm:$0xff]  ;;  %v1966_v6 = vld [vmem:[%s3081_s1 + $0x138] sm:$0xff] }
   0x3   :  { %69 = vmatpush1.msra.mxu0 %v1939_v1  ;;  %v1972_v7 = vld [vmem:[%s3081_s1 + $0x128] sm:$0xff]  ;;  %v1978_v8 = vld [vmem:[%s3081_s1 + $0x120] sm:$0xff]  ;;  %v1984_v9 = vld [vmem:[%s3081_s1 + $0x110] sm:$0xff] }
   0x4   :  { %70 = vmatprep.subr.mxu0 %v1944_v2  ;;  %v1990_v10 = vld [vmem:[%s3081_s1 + $0x108] sm:$0xff]  ;;  %v1995_v11 = vld [vmem:[%s3081_s1 + $0x178] sm:$0xff]  ;;  %v2007_v13 = vld [vmem:[%s3081_s1 + $0x160] sm:$0xff] }
   0x5   :  { %71 = vmatpush1.msra.mxu0 %v1952_v4  ;;  %v2001_v12 = vld [vmem:[%s3081_s1 + $0xf8] sm:$0xff]  ;;  %1537 = vmatpush3.msra.mxu1 %v1995_v11  ;;  %v2013_v14 = vld [vmem:[%s3081_s1 + $0xf0] sm:$0xff]  ;;  %v2019_v15 = vld [vmem:[%s3081_s1 + $0x148] sm:$0xff] }
   0x6   :  { %72 = vmatprep.subr.mxu0 %v1960_v5  ;;  %1538 = vmatprep.subr.mxu1 %v3084_v3  ;;  %v2025_v16 = vld [vmem:[%s3081_s1 + $0xe0] sm:$0xff]  ;;  %v2032_v17 = vld [vmem:[%s3081_s1 + $0xd8] sm:$0xff]  ;;  %v2038_v18 = vld [vmem:[%s3081_s1 + $0x130] sm:$0xff] }
   0x7   :  { %73 = vmatpush1.msra.mxu0 %v1966_v6  ;;  %1539 = vmatpush3.msra.mxu1 %v2007_v13  ;;  %v2044_v19 = vld [vmem:[%s3081_s1 + $0xc8] sm:$0xff]  ;;  %v2051_v20 = vld [vmem:[%s3081_s1 + $0xc0] sm:$0xff]  ;;  %v2057_v21 = vld [vmem:[%s3081_s1 + $0x118] sm:$0xff] }
   0x8   :  { %74 = vmatprep.subr.mxu0 %v1972_v7  ;;  %1540 = vmatprep.subr.mxu1 %v3084_v3  ;;  %v2063_v22 = vld [vmem:[%s3081_s1 + $0xb0] sm:$0xff]  ;;  %v2070_v23 = vld [vmem:[%s3081_s1 + $0xa8] sm:$0xff]  ;;  %v2076_v24 = vld [vmem:[%s3081_s1 + $0x100] sm:$0xff] }
   0x9   :  { %75 = vmatpush1.msra.mxu0 %v1978_v8  ;;  %1541 = vmatpush3.msra.mxu1 %v2019_v15  ;;  %v2082_v25 = vld [vmem:[%s3081_s1 + $0x98] sm:$0xff]  ;;  %v2089_v26 = vld [vmem:[%s3081_s1 + $0x90] sm:$0xff]  ;;  %v2095_v27 = vld [vmem:[%s3081_s1 + $0xe8] sm:$0xff] }
   0xa   :  { %76 = vmatprep.subr.mxu0 %v1984_v9  ;;  %1542 = vmatprep.subr.mxu1 %v3084_v3  ;;  %v2101_v28 = vld [vmem:[%s3081_s1 + $0x80] sm:$0xff]  ;;  %v2108_v29 = vld [vmem:[%s3081_s1 + $0x78] sm:$0xff]  ;;  %v2114_v30 = vld [vmem:[%s3081_s1 + $0xd0] sm:$0xff] }
   0xb   :  { %77 = vmatpush1.msra.mxu0 %v1990_v10  ;;  %1543 = vmatpush3.msra.mxu1 %v2038_v18  ;;  %v2120_v31 = vld [vmem:[%s3081_s1 + $0x68] sm:$0xff]  ;;  %v2127_v32 = vld [vmem:[%s3081_s1 + $0x60] sm:$0xff]  ;;  %v2133_v33 = vld [vmem:[%s3081_s1 + $0xb8] sm:$0xff] }
   0xc   :  { %78 = vmatprep.subr.mxu0 %v2001_v12  ;;  %1544 = vmatprep.subr.mxu1 %v3084_v3  ;;  %v2139_v34 = vld [vmem:[%s3081_s1 + $0x50] sm:$0xff]  ;;  %v2146_v35 = vld [vmem:[%s3081_s1 + $0x48] sm:$0xff]  ;;  %v2152_v36 = vld [vmem:[%s3081_s1 + $0xa0] sm:$0xff] }
   0xd   :  { %79 = vmatpush1.msra.mxu0 %v2013_v14  ;;  %1545 = vmatpush3.msra.mxu1 %v2057_v21  ;;  %v2158_v37 = vld [vmem:[%s3081_s1 + $0x38] sm:$0xff]  ;;  %v2165_v38 = vld [vmem:[%s3081_s1 + $0x30] sm:$0xff]  ;;  %v2171_v39 = vld [vmem:[%s3081_s1 + $0x88] sm:$0xff] }
   0xe   :  { %80 = vmatprep.subr.mxu0 %v2025_v16  ;;  %1546 = vmatprep.subr.mxu1 %v3084_v3  ;;  %v2177_v40 = vld [vmem:[%s3081_s1 + $0x20] sm:$0xff]  ;;  %v2184_v41 = vld [vmem:[%s3081_s1 + $0x18] sm:$0xff]  ;;  %v2190_v42 = vld [vmem:[%s3081_s1 + $0x70] sm:$0xff] }
   0xf   :  { %81 = vmatpush1.msra.mxu0 %v2032_v17  ;;  %1547 = vmatpush3.msra.mxu1 %v2076_v24  ;;  %v2196_v43 = vld [vmem:[%s3081_s1 + $0x8] sm:$0xff]  ;;  %v2203_v44 = vld [vmem:[%s3081_s1] sm:$0xff]  ;;  %v2209_v45 = vld [vmem:[%s3081_s1 + $0x58] sm:$0xff] }
  0x10   :  { %82 = vmatprep.subr.mxu0 %v2044_v19  ;;  %1548 = vmatprep.subr.mxu1 %v3084_v3  ;;  %3095 = vst [vmem:[#allocation4_spill] sm:$0xff] %v2203_v44  ;;  %v2218_v46 = vld [vmem:[%s3081_s1 + $0x40] sm:$0xff]  ;;  %v2227_v47 = vld [vmem:[%s3081_s1 + $0x28] sm:$0xff]  ;;  %v2235_v48 = vld [vmem:[%s3081_s1 + $0x10] sm:$0xff] }
  0x11   :  { %83 = vmatpush1.msra.mxu0 %v2051_v20  ;;  %1549 = vmatpush3.msra.mxu1 %v2095_v27  ;;  %3096 = vst [vmem:[#allocation5_spill] sm:$0xff] %v2235_v48  ;;  %v65_v49 = vld [vmem:[%s3082_s0] sm:$0xff]  ;;  %v66_v55 = vld [vmem:[%s3082_s0 + $0x8] sm:$0xff]  ;;  %v67_v62 = vld [vmem:[%s3082_s0 + $0x10] sm:$0xff] }
  0x12   :  { %84 = vmatprep.subr.mxu0 %v2063_v22  ;;  %1550 = vmatprep.subr.mxu1 %v3084_v3 }
  0x13   :  { %85 = vmatpush1.msra.mxu0 %v2070_v23  ;;  %1551 = vmatpush3.msra.mxu1 %v2114_v30 }
  0x14   :  { %86 = vmatprep.subr.mxu0 %v2082_v25  ;;  %1552 = vmatprep.subr.mxu1 %v3084_v3 }
  0x15   :  { %87 = vmatpush1.msra.mxu0 %v2089_v26  ;;  %1553 = vmatpush3.msra.mxu1 %v2133_v33 }
  0x16   :  { %88 = vmatprep.subr.mxu0 %v2101_v28  ;;  %1554 = vmatprep.subr.mxu1 %v3084_v3 }
  0x17   :  { %89 = vmatpush1.msra.mxu0 %v2108_v29  ;;  %1555 = vmatpush3.msra.mxu1 %v2152_v36 }
  0x18   :  { %90 = vmatprep.subr.mxu0 %v2120_v31  ;;  %1556 = vmatprep.subr.mxu1 %v3084_v3 }
  0x19   :  { %91 = vmatpush1.msra.mxu0 %v2127_v32  ;;  %1557 = vmatpush3.msra.mxu1 %v2171_v39 }
  0x1a   :  { %92 = vmatprep.subr.mxu0 %v2139_v34  ;;  %1558 = vmatprep.subr.mxu1 %v3084_v3 }
  0x1b   :  { %93 = vmatpush1.msra.mxu0 %v2146_v35  ;;  %1559 = vmatpush3.msra.mxu1 %v2190_v42 }
  0x1c   :  { %94 = vmatprep.subr.mxu0 %v2158_v37  ;;  %1560 = vmatprep.subr.mxu1 %v3084_v3 }
  0x1d   :  { %95 = vmatpush1.msra.mxu0 %v2165_v38  ;;  %1561 = vmatpush3.msra.mxu1 %v2209_v45 }
  0x1e   :  { %96 = vmatprep.subr.mxu0 %v2177_v40  ;;  %1562 = vmatprep.subr.mxu1 %v3084_v3 }
  0x1f   :  { %97 = vmatpush1.msra.mxu0 %v2184_v41  ;;  %1563 = vmatpush3.msra.mxu1 %v2218_v46 }
  0x20   :  { %98 = vmatprep.subr.mxu0 %v2196_v43  ;;  %1564 = vmatprep.subr.mxu1 %v3084_v3 }
  0x21   :  { %99 = vmatpush1.msra.mxu0 %v2203_v44  ;;  %1565 = vmatpush3.msra.mxu1 %v2227_v47 }
  0x22   :  { %133 = vmatmul.mubr.f32.vlgmr.msra.gmra.mxu0 %v3084_v3  ;;  %230 = vmatprep.subr.mxu0 %v1934_v0 }
  0x23   :  { %231 = vmatpush1.msra.mxu0 %v1939_v1  ;;  %1566 = vmatprep.subr.mxu1 %v3084_v3 }
  0x24   :  { %232 = vmatprep.subr.mxu0 %v1944_v2  ;;  %1567 = vmatpush3.msra.mxu1 %v2235_v48 }
  0x25   :  { %233 = vmatpush1.msra.mxu0 %v1952_v4  ;;  %1569 = vmatmul.mubr.f32.vlgmr.msra.gmra.mxu1 %v3084_v3 }
  0x26   :  { %234 = vmatprep.subr.mxu0 %v1960_v5  ;;  %1571 = vmatprep.subr.mxu1 %v3084_v3 }
  0x27   :  { %1572 = vmatpush3.msra.mxu1 %v1995_v11  ;;  %235 = vmatpush1.msra.mxu0 %v1966_v6 }
  0x28   :  { %1573 = vmatprep.subr.mxu1 %v3084_v3  ;;  %236 = vmatprep.subr.mxu0 %v1972_v7 }
  0x29   :  { %1574 = vmatpush3.msra.mxu1 %v2007_v13  ;;  %237 = vmatpush1.msra.mxu0 %v1978_v8 }
  0x2a   :  { %1575 = vmatprep.subr.mxu1 %v3084_v3  ;;  %238 = vmatprep.subr.mxu0 %v1984_v9 }
  0x2b   :  { %1576 = vmatpush3.msra.mxu1 %v2019_v15  ;;  %239 = vmatpush1.msra.mxu0 %v1990_v10 }
  0x2c   :  { %1577 = vmatprep.subr.mxu1 %v3084_v3  ;;  %240 = vmatprep.subr.mxu0 %v2001_v12 }
  0x2d   :  { %1578 = vmatpush3.msra.mxu1 %v2038_v18  ;;  %241 = vmatpush1.msra.mxu0 %v2013_v14 }
  0x2e   :  { %1579 = vmatprep.subr.mxu1 %v3084_v3  ;;  %242 = vmatprep.subr.mxu0 %v2025_v16 }
  0x2f   :  { %1580 = vmatpush3.msra.mxu1 %v2057_v21  ;;  %243 = vmatpush1.msra.mxu0 %v2032_v17 }
  0x30   :  { %1581 = vmatprep.subr.mxu1 %v3084_v3  ;;  %244 = vmatprep.subr.mxu0 %v2044_v19 }
  0x31   :  { %1582 = vmatpush3.msra.mxu1 %v2076_v24  ;;  %245 = vmatpush1.msra.mxu0 %v2051_v20 }
  0x32   :  { %1583 = vmatprep.subr.mxu1 %v3084_v3  ;;  %246 = vmatprep.subr.mxu0 %v2063_v22 }
  0x33   :  { %1584 = vmatpush3.msra.mxu1 %v2095_v27  ;;  %247 = vmatpush1.msra.mxu0 %v2070_v23 }
  0x34   :  { %1585 = vmatprep.subr.mxu1 %v3084_v3  ;;  %248 = vmatprep.subr.mxu0 %v2082_v25 }
  0x35   :  { %1586 = vmatpush3.msra.mxu1 %v2114_v30  ;;  %249 = vmatpush1.msra.mxu0 %v2089_v26 }
  0x36   :  { %1587 = vmatprep.subr.mxu1 %v3084_v3  ;;  %250 = vmatprep.subr.mxu0 %v2101_v28 }
  0x37   :  { %1588 = vmatpush3.msra.mxu1 %v2133_v33  ;;  %251 = vmatpush1.msra.mxu0 %v2108_v29 }
  0x38   :  { %1589 = vmatprep.subr.mxu1 %v3084_v3  ;;  %252 = vmatprep.subr.mxu0 %v2120_v31 }
  0x39   :  { %1590 = vmatpush3.msra.mxu1 %v2152_v36  ;;  %253 = vmatpush1.msra.mxu0 %v2127_v32 }
  0x3a   :  { %1591 = vmatprep.subr.mxu1 %v3084_v3  ;;  %254 = vmatprep.subr.mxu0 %v2139_v34 }
  0x3b   :  { %1592 = vmatpush3.msra.mxu1 %v2171_v39  ;;  %255 = vmatpush1.msra.mxu0 %v2146_v35 }
  0x3c   :  { %1593 = vmatprep.subr.mxu1 %v3084_v3  ;;  %256 = vmatprep.subr.mxu0 %v2158_v37 }
  0x3d   :  { %1594 = vmatpush3.msra.mxu1 %v2190_v42  ;;  %257 = vmatpush1.msra.mxu0 %v2165_v38 }
  0x3e   :  { %1595 = vmatprep.subr.mxu1 %v3084_v3  ;;  %258 = vmatprep.subr.mxu0 %v2177_v40 }
  0x3f   :  { %1596 = vmatpush3.msra.mxu1 %v2209_v45  ;;  %259 = vmatpush1.msra.mxu0 %v2184_v41 }
  0x40   :  { %1597 = vmatprep.subr.mxu1 %v3084_v3  ;;  %260 = vmatprep.subr.mxu0 %v2196_v43 }
  0x41   :  { %1598 = vmatpush3.msra.mxu1 %v2218_v46  ;;  %261 = vmatpush1.msra.mxu0 %v2203_v44 }
  0x42   :  { %1599 = vmatprep.subr.mxu1 %v3084_v3  ;;  %294 = vmatprep.mubr.f32.mxu0 %v3084_v3 }
  0x43   :  { %1600 = vmatpush3.msra.mxu1 %v2227_v47  ;;  %1603 = vmatprep.mubr.msk.f32.mxu1 %vm1915_vm0, %v3084_v3 }
  0x44   :  { %1601 = vmatprep.subr.mxu1 %v3084_v3  ;;  %393 = vmatprep.subr.mxu0 %v1934_v0 }
  0x45   :  { %1602 = vmatpush3.msra.mxu1 %v2235_v48 }
  0x46   :  { %1606 = vmatprep.subr.mxu1 %v3084_v3 }
  0xe2   :  { %v134_v50 = vpop.f32.mrf.mxu0 }
  0xe3   :  { %v209_v51 = vadd.f32 %v134_v50, %v65_v49 }
  0xe4   :  { %v136_v56 = vpop.f32.mrf.mxu0 }
  0xe5   :  { %v210_v52 = vmul.f32 0.5, %v209_v51  ;;  %v205_v53 = vpop.f32.mrf.mxu1  ;;  %v214_v57 = vadd.f32 %v136_v56, %v66_v55  ;;  %v1372_v55 = vld [vmem:[%s3082_s0 + $0x18] sm:$0xff] }
  0xe7   :  { %1818 = vtanh.f32 %v210_v52  ;;  %v1570_v54 = vpop.f32.mrf.mxu1  ;;  %v215_v58 = vmul.f32 0.5, %v214_v57 }
  0xe9   :  { %1820 = vtanh.f32 %v215_v58 }
  0xf4   :  { %v1819_v59 = vpop.eup %1818 }
  0xf5   :  { %v212_v60 = vadd.f32 1.0, %v1819_v59 }
  0xf6   :  { %v1821_v50 = vpop.eup %1820 }
  0xf7   :  { %v213_v61 = vmul.f32 0.5, %v212_v60  ;;  %v217_v51 = vadd.f32 1.0, %v1821_v50 }
  0xf9   :  { %v219_v63 = vmul.f32 %v213_v61, %v205_v53  ;;  %v218_v54 = vmul.f32 0.5, %v217_v51  ;;  %v3097_v53 = vmov 0.0   ;;  %v1373_v61 = vld [vmem:[%s3082_s0 + $0x20] sm:$0xff] }
  0xfb   :  { %v220_v49 = vadd.f32 %v219_v63, %v67_v62 }
  0xfd   :  { %1822 = vtanh.f32 %v220_v49 }
 0x10a   :  { %v1823_v52 = vpop.eup %1822 }
 0x10b   :  { %v222_v3 = vsub.f32 0.0, %v1823_v52 }
 0x10d   :  { %v223_v0 = vmul.f32 %v222_v3, %v218_v54  ;;  %v3099_v3 = vld [vmem:[#allocation3_spill] sm:$0xff]  ;;  %v1374_v54 = vld [vmem:[%s3082_s0 + $0x28] sm:$0xff] }
 0x10f   :  { %v2318_v48 = vadd.f32 %v1823_v52, %v223_v0  ;;  %v3098_v0 = vld [vmem:[#allocation5_spill] sm:$0xff] }
 0x111   :  { %225 = vst [vmem:[%s3083_s2] sm:$0xff] %v2318_v48  ;;  %295 = vmatmul.mubr.f32.vlgmr.msra.gmra.mxu0 %v2318_v48  ;;  %1604 = vmatmul.mubr.f32.vlgmr.msra.gmra.mxu1 %v2318_v48 }
 0x112   :  { %394 = vmatpush1.msra.mxu0 %v1939_v1  ;;  %1607 = vmatpush3.msra.mxu1 %v1995_v11 }
 0x113   :  { %395 = vmatprep.subr.mxu0 %v1944_v2  ;;  %1608 = vmatprep.subr.mxu1 %v3097_v53 }
 0x114   :  { %396 = vmatpush1.msra.mxu0 %v1952_v4  ;;  %1609 = vmatpush3.msra.mxu1 %v2007_v13 }
 0x115   :  { %397 = vmatprep.subr.mxu0 %v1960_v5  ;;  %1610 = vmatprep.subr.mxu1 %v3097_v53 }
 0x116   :  { %398 = vmatpush1.msra.mxu0 %v1966_v6  ;;  %1611 = vmatpush3.msra.mxu1 %v2019_v15 }
 0x117   :  { %399 = vmatprep.subr.mxu0 %v1972_v7  ;;  %1612 = vmatprep.subr.mxu1 %v3097_v53 }
 0x118   :  { %400 = vmatpush1.msra.mxu0 %v1978_v8  ;;  %1613 = vmatpush3.msra.mxu1 %v2038_v18 }
 0x119   :  { %401 = vmatprep.subr.mxu0 %v1984_v9  ;;  %1614 = vmatprep.subr.mxu1 %v3097_v53 }
 0x11a   :  { %402 = vmatpush1.msra.mxu0 %v1990_v10  ;;  %1615 = vmatpush3.msra.mxu1 %v2057_v21 }
 0x11b   :  { %403 = vmatprep.subr.mxu0 %v2001_v12  ;;  %1616 = vmatprep.subr.mxu1 %v3097_v53 }
 0x11c   :  { %404 = vmatpush1.msra.mxu0 %v2013_v14  ;;  %1617 = vmatpush3.msra.mxu1 %v2076_v24 }
 0x11d   :  { %405 = vmatprep.subr.mxu0 %v2025_v16  ;;  %1618 = vmatprep.subr.mxu1 %v3097_v53 }
 0x11e   :  { %406 = vmatpush1.msra.mxu0 %v2032_v17  ;;  %1619 = vmatpush3.msra.mxu1 %v2095_v27 }
 0x11f   :  { %407 = vmatprep.subr.mxu0 %v2044_v19  ;;  %1620 = vmatprep.subr.mxu1 %v3097_v53 }
 0x120   :  { %408 = vmatpush1.msra.mxu0 %v2051_v20  ;;  %1621 = vmatpush3.msra.mxu1 %v2114_v30 }
 0x121   :  { %409 = vmatprep.subr.mxu0 %v2063_v22  ;;  %1622 = vmatprep.subr.mxu1 %v3097_v53 }
 0x122   :  { %410 = vmatpush1.msra.mxu0 %v2070_v23  ;;  %1623 = vmatpush3.msra.mxu1 %v2133_v33 }
 0x123   :  { %411 = vmatprep.subr.mxu0 %v2082_v25  ;;  %1624 = vmatprep.subr.mxu1 %v3097_v53 }
 0x124   :  { %412 = vmatpush1.msra.mxu0 %v2089_v26  ;;  %1625 = vmatpush3.msra.mxu1 %v2152_v36 }
 0x125   :  { %413 = vmatprep.subr.mxu0 %v2101_v28  ;;  %1626 = vmatprep.subr.mxu1 %v3097_v53 }
 0x126   :  { %414 = vmatpush1.msra.mxu0 %v2108_v29  ;;  %1627 = vmatpush3.msra.mxu1 %v2171_v39 }
 0x127   :  { %415 = vmatprep.subr.mxu0 %v2120_v31  ;;  %1628 = vmatprep.subr.mxu1 %v3097_v53 }
 0x128   :  { %416 = vmatpush1.msra.mxu0 %v2127_v32  ;;  %1629 = vmatpush3.msra.mxu1 %v2190_v42 }
 0x129   :  { %417 = vmatprep.subr.mxu0 %v2139_v34  ;;  %1630 = vmatprep.subr.mxu1 %v3097_v53 }
 0x12a   :  { %418 = vmatpush1.msra.mxu0 %v2146_v35  ;;  %1631 = vmatpush3.msra.mxu1 %v2209_v45 }
 0x12b   :  { %419 = vmatprep.subr.mxu0 %v2158_v37  ;;  %1632 = vmatprep.subr.mxu1 %v3097_v53 }
 0x12c   :  { %420 = vmatpush1.msra.mxu0 %v2165_v38  ;;  %1633 = vmatpush3.msra.mxu1 %v2218_v46 }
 0x12d   :  { %421 = vmatprep.subr.mxu0 %v2177_v40  ;;  %1634 = vmatprep.subr.mxu1 %v3097_v53 }
 0x12e   :  { %422 = vmatpush1.msra.mxu0 %v2184_v41  ;;  %1635 = vmatpush3.msra.mxu1 %v2227_v47 }
 0x12f   :  { %423 = vmatprep.subr.mxu0 %v2196_v43  ;;  %1636 = vmatprep.subr.mxu1 %v3097_v53 }
 0x130   :  { %424 = vmatpush1.msra.mxu0 %v2203_v44  ;;  %457 = vmatprep.mubr.f32.mxu0 %v3097_v53 }
 0x131   :  { %1637 = vmatpush3.msra.mxu1 %v3098_v0  ;;  %1638 = vmatprep.mubr.msk.f32.mxu1 %vm1915_vm0, %v3097_v53 }
 0x132   :  { %556 = vmatprep.subr.mxu0 %v3099_v3  ;;  %1641 = vmatprep.subr.mxu1 %v3097_v53 }
 0x1d1   :  { %v296_v56 = vpop.f32.mrf.mxu0  ;;  %v367_v57 = vpop.f32.mrf.mxu1 }
 0x1d2   :  { %v371_v58 = vadd.f32 %v1372_v55, %v296_v56 }
 0x1d3   :  { %v1605_v59 = vpop.f32.mrf.mxu1  ;;  %v298_v62 = vpop.f32.mrf.mxu0 }
 0x1d4   :  { %v372_v60 = vmul.f32 0.5, %v371_v58  ;;  %v376_v63 = vadd.f32 %v1373_v61, %v298_v62 }
 0x1d6   :  { %1824 = vtanh.f32 %v372_v60  ;;  %v377_v49 = vmul.f32 0.5, %v376_v63 }
 0x1d8   :  { %1826 = vtanh.f32 %v377_v49 }
 0x1e3   :  { %v1825_v50 = vpop.eup %1824 }
 0x1e4   :  { %v374_v51 = vadd.f32 1.0, %v1825_v50 }
 0x1e5   :  { %v1827_v56 = vpop.eup %1826 }
 0x1e6   :  { %v375_v52 = vmul.f32 0.5, %v374_v51  ;;  %v379_v58 = vadd.f32 1.0, %v1827_v56  ;;  %v1377_v51 = vld [vmem:[%s3082_s0 + $0x38] sm:$0xff] }
 0x1e8   :  { %v381_v3 = vmul.f32 %v375_v52, %v367_v57  ;;  %v380_v60 = vmul.f32 0.5, %v379_v58 }
 0x1ea   :  { %v382_v55 = vadd.f32 %v1374_v54, %v381_v3  ;;  %v1376_v3 = vld [vmem:[%s3082_s0 + $0x30] sm:$0xff] }
 0x1ec   :  { %1828 = vtanh.f32 %v382_v55 }
 0x1f9   :  { %v1829_v59 = vpop.eup %1828 }
 0x1fa   :  { %v384_v0 = vsub.f32 %v2318_v48, %v1829_v59  ;;  %v3101_v48 = vld [vmem:[#allocation5_spill] sm:$0xff] }
 0x1fc   :  { %v385_v44 = vmul.f32 %v384_v0, %v380_v60  ;;  %v3102_v0 = vld [vmem:[#allocation3_spill] sm:$0xff] }
 0x1fd   :  { %v1378_v60 = vld [vmem:[%s3082_s0 + $0x40] sm:$0xff] }
 0x1fe   :  { %v2403_v61 = vadd.f32 %v1829_v59, %v385_v44  ;;  %v3100_v44 = vld [vmem:[#allocation4_spill] sm:$0xff] }
 0x200   :  { %1375 = vst [vmem:[%s3083_s2 + $0x8] sm:$0xff] %v2403_v61  ;;  %458 = vmatmul.mubr.f32.vlgmr.msra.gmra.mxu0 %v2403_v61  ;;  %1639 = vmatmul.mubr.f32.vlgmr.msra.gmra.mxu1 %v2403_v61 }
 0x201   :  { %557 = vmatpush1.msra.mxu0 %v1939_v1  ;;  %1642 = vmatpush3.msra.mxu1 %v1995_v11 }
 0x202   :  { %558 = vmatprep.subr.mxu0 %v1944_v2  ;;  %1643 = vmatprep.subr.mxu1 %v3097_v53 }
 0x203   :  { %559 = vmatpush1.msra.mxu0 %v1952_v4  ;;  %1644 = vmatpush3.msra.mxu1 %v2007_v13 }
 0x204   :  { %560 = vmatprep.subr.mxu0 %v1960_v5  ;;  %1645 = vmatprep.subr.mxu1 %v3097_v53 }
 0x205   :  { %561 = vmatpush1.msra.mxu0 %v1966_v6  ;;  %1646 = vmatpush3.msra.mxu1 %v2019_v15 }
 0x206   :  { %562 = vmatprep.subr.mxu0 %v1972_v7  ;;  %1647 = vmatprep.subr.mxu1 %v3097_v53 }
 0x207   :  { %563 = vmatpush1.msra.mxu0 %v1978_v8  ;;  %1648 = vmatpush3.msra.mxu1 %v2038_v18 }
 0x208   :  { %564 = vmatprep.subr.mxu0 %v1984_v9  ;;  %1649 = vmatprep.subr.mxu1 %v3097_v53 }
 0x209   :  { %565 = vmatpush1.msra.mxu0 %v1990_v10  ;;  %1650 = vmatpush3.msra.mxu1 %v2057_v21 }
 0x20a   :  { %566 = vmatprep.subr.mxu0 %v2001_v12  ;;  %1651 = vmatprep.subr.mxu1 %v3097_v53 }
 0x20b   :  { %567 = vmatpush1.msra.mxu0 %v2013_v14  ;;  %1652 = vmatpush3.msra.mxu1 %v2076_v24 }
 0x20c   :  { %568 = vmatprep.subr.mxu0 %v2025_v16  ;;  %1653 = vmatprep.subr.mxu1 %v3097_v53 }
 0x20d   :  { %569 = vmatpush1.msra.mxu0 %v2032_v17  ;;  %1654 = vmatpush3.msra.mxu1 %v2095_v27 }
 0x20e   :  { %570 = vmatprep.subr.mxu0 %v2044_v19  ;;  %1655 = vmatprep.subr.mxu1 %v3097_v53 }
 0x20f   :  { %571 = vmatpush1.msra.mxu0 %v2051_v20  ;;  %1656 = vmatpush3.msra.mxu1 %v2114_v30 }
 0x210   :  { %572 = vmatprep.subr.mxu0 %v2063_v22  ;;  %1657 = vmatprep.subr.mxu1 %v3097_v53 }
 0x211   :  { %573 = vmatpush1.msra.mxu0 %v2070_v23  ;;  %1658 = vmatpush3.msra.mxu1 %v2133_v33 }
 0x212   :  { %574 = vmatprep.subr.mxu0 %v2082_v25  ;;  %1659 = vmatprep.subr.mxu1 %v3097_v53 }
 0x213   :  { %575 = vmatpush1.msra.mxu0 %v2089_v26  ;;  %1660 = vmatpush3.msra.mxu1 %v2152_v36 }
 0x214   :  { %576 = vmatprep.subr.mxu0 %v2101_v28  ;;  %1661 = vmatprep.subr.mxu1 %v3097_v53 }
 0x215   :  { %577 = vmatpush1.msra.mxu0 %v2108_v29  ;;  %1662 = vmatpush3.msra.mxu1 %v2171_v39 }
 0x216   :  { %578 = vmatprep.subr.mxu0 %v2120_v31  ;;  %1663 = vmatprep.subr.mxu1 %v3097_v53 }
 0x217   :  { %579 = vmatpush1.msra.mxu0 %v2127_v32  ;;  %1664 = vmatpush3.msra.mxu1 %v2190_v42 }
 0x218   :  { %580 = vmatprep.subr.mxu0 %v2139_v34  ;;  %1665 = vmatprep.subr.mxu1 %v3097_v53 }
 0x219   :  { %581 = vmatpush1.msra.mxu0 %v2146_v35  ;;  %1666 = vmatpush3.msra.mxu1 %v2209_v45 }
 0x21a   :  { %582 = vmatprep.subr.mxu0 %v2158_v37  ;;  %1667 = vmatprep.subr.mxu1 %v3097_v53 }
 0x21b   :  { %583 = vmatpush1.msra.mxu0 %v2165_v38  ;;  %1668 = vmatpush3.msra.mxu1 %v2218_v46 }
 0x21c   :  { %584 = vmatprep.subr.mxu0 %v2177_v40  ;;  %1669 = vmatprep.subr.mxu1 %v3097_v53 }
 0x21d   :  { %585 = vmatpush1.msra.mxu0 %v2184_v41  ;;  %1670 = vmatpush3.msra.mxu1 %v2227_v47 }
 0x21e   :  { %586 = vmatprep.subr.mxu0 %v2196_v43  ;;  %1671 = vmatprep.subr.mxu1 %v3097_v53 }
 0x21f   :  { %587 = vmatpush1.msra.mxu0 %v3100_v44  ;;  %620 = vmatprep.mubr.f32.mxu0 %v3097_v53 }
 0x220   :  { %1672 = vmatpush3.msra.mxu1 %v3101_v48  ;;  %1673 = vmatprep.mubr.msk.f32.mxu1 %vm1915_vm0, %v3097_v53 }
 0x221   :  { %719 = vmatprep.subr.mxu0 %v3102_v0  ;;  %1676 = vmatprep.subr.mxu1 %v3097_v53 }
 0x2c0   :  { %v459_v57 = vpop.f32.mrf.mxu0  ;;  %v530_v62 = vpop.f32.mrf.mxu1 }
 0x2c1   :  { %v534_v63 = vadd.f32 %v1376_v3, %v459_v57 }
 0x2c2   :  { %v1640_v49 = vpop.f32.mrf.mxu1  ;;  %v461_v52 = vpop.f32.mrf.mxu0 }
 0x2c3   :  { %v535_v50 = vmul.f32 0.5, %v534_v63  ;;  %v539_v54 = vadd.f32 %v1377_v51, %v461_v52 }
 0x2c5   :  { %1830 = vtanh.f32 %v535_v50  ;;  %v540_v55 = vmul.f32 0.5, %v539_v54 }
 0x2c7   :  { %1832 = vtanh.f32 %v540_v55 }
 0x2d2   :  { %v1831_v56 = vpop.eup %1830 }
 0x2d3   :  { %v537_v58 = vadd.f32 1.0, %v1831_v56 }
 0x2d4   :  { %v1833_v57 = vpop.eup %1832 }
 0x2d5   :  { %v538_v59 = vmul.f32 0.5, %v537_v58  ;;  %v542_v63 = vadd.f32 1.0, %v1833_v57  ;;  %v1381_v58 = vld [vmem:[%s3082_s0 + $0x50] sm:$0xff] }
 0x2d7   :  { %v544_v0 = vmul.f32 %v538_v59, %v530_v62  ;;  %v543_v50 = vmul.f32 0.5, %v542_v63 }
 0x2d9   :  { %v545_v3 = vadd.f32 %v1378_v60, %v544_v0  ;;  %v1380_v0 = vld [vmem:[%s3082_s0 + $0x48] sm:$0xff] }
 0x2db   :  { %1834 = vtanh.f32 %v545_v3 }
 0x2e8   :  { %v1835_v49 = vpop.eup %1834 }
 0x2e9   :  { %v547_v48 = vsub.f32 %v2403_v61, %v1835_v49  ;;  %v3103_v61 = vld [vmem:[#allocation4_spill] sm:$0xff] }
 0x2eb   :  { %v548_v44 = vmul.f32 %v547_v48, %v543_v50  ;;  %v3105_v48 = vld [vmem:[#allocation3_spill] sm:$0xff]  ;;  %v1382_v50 = vld [vmem:[%s3082_s0 + $0x58] sm:$0xff] }
 0x2ed   :  { %v2488_v51 = vadd.f32 %v1835_v49, %v548_v44  ;;  %v3104_v44 = vld [vmem:[#allocation5_spill] sm:$0xff] }
 0x2ef   :  { %1379 = vst [vmem:[%s3083_s2 + $0x10] sm:$0xff] %v2488_v51  ;;  %621 = vmatmul.mubr.f32.vlgmr.msra.gmra.mxu0 %v2488_v51  ;;  %1674 = vmatmul.mubr.f32.vlgmr.msra.gmra.mxu1 %v2488_v51 }
 0x2f0   :  { %720 = vmatpush1.msra.mxu0 %v1939_v1  ;;  %1677 = vmatpush3.msra.mxu1 %v1995_v11 }
 0x2f1   :  { %721 = vmatprep.subr.mxu0 %v1944_v2  ;;  %1678 = vmatprep.subr.mxu1 %v3097_v53 }
 0x2f2   :  { %722 = vmatpush1.msra.mxu0 %v1952_v4  ;;  %1679 = vmatpush3.msra.mxu1 %v2007_v13 }
 0x2f3   :  { %723 = vmatprep.subr.mxu0 %v1960_v5  ;;  %1680 = vmatprep.subr.mxu1 %v3097_v53 }
 0x2f4   :  { %724 = vmatpush1.msra.mxu0 %v1966_v6  ;;  %1681 = vmatpush3.msra.mxu1 %v2019_v15 }
 0x2f5   :  { %725 = vmatprep.subr.mxu0 %v1972_v7  ;;  %1682 = vmatprep.subr.mxu1 %v3097_v53 }
 0x2f6   :  { %726 = vmatpush1.msra.mxu0 %v1978_v8  ;;  %1683 = vmatpush3.msra.mxu1 %v2038_v18 }
 0x2f7   :  { %727 = vmatprep.subr.mxu0 %v1984_v9  ;;  %1684 = vmatprep.subr.mxu1 %v3097_v53 }
 0x2f8   :  { %728 = vmatpush1.msra.mxu0 %v1990_v10  ;;  %1685 = vmatpush3.msra.mxu1 %v2057_v21 }
 0x2f9   :  { %729 = vmatprep.subr.mxu0 %v2001_v12  ;;  %1686 = vmatprep.subr.mxu1 %v3097_v53 }
 0x2fa   :  { %730 = vmatpush1.msra.mxu0 %v2013_v14  ;;  %1687 = vmatpush3.msra.mxu1 %v2076_v24 }
 0x2fb   :  { %731 = vmatprep.subr.mxu0 %v2025_v16  ;;  %1688 = vmatprep.subr.mxu1 %v3097_v53 }
 0x2fc   :  { %732 = vmatpush1.msra.mxu0 %v2032_v17  ;;  %1689 = vmatpush3.msra.mxu1 %v2095_v27 }
 0x2fd   :  { %733 = vmatprep.subr.mxu0 %v2044_v19  ;;  %1690 = vmatprep.subr.mxu1 %v3097_v53 }
 0x2fe   :  { %734 = vmatpush1.msra.mxu0 %v2051_v20  ;;  %1691 = vmatpush3.msra.mxu1 %v2114_v30 }
 0x2ff   :  { %735 = vmatprep.subr.mxu0 %v2063_v22  ;;  %1692 = vmatprep.subr.mxu1 %v3097_v53 }
 0x300   :  { %736 = vmatpush1.msra.mxu0 %v2070_v23  ;;  %1693 = vmatpush3.msra.mxu1 %v2133_v33 }
 0x301   :  { %737 = vmatprep.subr.mxu0 %v2082_v25  ;;  %1694 = vmatprep.subr.mxu1 %v3097_v53 }
 0x302   :  { %738 = vmatpush1.msra.mxu0 %v2089_v26  ;;  %1695 = vmatpush3.msra.mxu1 %v2152_v36 }
 0x303   :  { %739 = vmatprep.subr.mxu0 %v2101_v28  ;;  %1696 = vmatprep.subr.mxu1 %v3097_v53 }
 0x304   :  { %740 = vmatpush1.msra.mxu0 %v2108_v29  ;;  %1697 = vmatpush3.msra.mxu1 %v2171_v39 }
 0x305   :  { %741 = vmatprep.subr.mxu0 %v2120_v31  ;;  %1698 = vmatprep.subr.mxu1 %v3097_v53 }
 0x306   :  { %742 = vmatpush1.msra.mxu0 %v2127_v32  ;;  %1699 = vmatpush3.msra.mxu1 %v2190_v42 }
 0x307   :  { %743 = vmatprep.subr.mxu0 %v2139_v34  ;;  %1700 = vmatprep.subr.mxu1 %v3097_v53 }
 0x308   :  { %744 = vmatpush1.msra.mxu0 %v2146_v35  ;;  %1701 = vmatpush3.msra.mxu1 %v2209_v45 }
 0x309   :  { %745 = vmatprep.subr.mxu0 %v2158_v37  ;;  %1702 = vmatprep.subr.mxu1 %v3097_v53 }
 0x30a   :  { %746 = vmatpush1.msra.mxu0 %v2165_v38  ;;  %1703 = vmatpush3.msra.mxu1 %v2218_v46 }
 0x30b   :  { %747 = vmatprep.subr.mxu0 %v2177_v40  ;;  %1704 = vmatprep.subr.mxu1 %v3097_v53 }
 0x30c   :  { %748 = vmatpush1.msra.mxu0 %v2184_v41  ;;  %1705 = vmatpush3.msra.mxu1 %v2227_v47 }
 0x30d   :  { %749 = vmatprep.subr.mxu0 %v2196_v43  ;;  %1706 = vmatprep.subr.mxu1 %v3097_v53 }
 0x30e   :  { %750 = vmatpush1.msra.mxu0 %v3103_v61  ;;  %783 = vmatprep.mubr.f32.mxu0 %v3097_v53 }
 0x30f   :  { %1707 = vmatpush3.msra.mxu1 %v3104_v44  ;;  %1708 = vmatprep.mubr.msk.f32.mxu1 %vm1915_vm0, %v3097_v53 }
 0x310   :  { %882 = vmatprep.subr.mxu0 %v3105_v48  ;;  %1711 = vmatprep.subr.mxu1 %v3097_v53 }
 0x3af   :  { %v622_v62 = vpop.f32.mrf.mxu0  ;;  %v693_v52 = vpop.f32.mrf.mxu1 }
 0x3b0   :  { %v697_v54 = vadd.f32 %v1380_v0, %v622_v62 }
 0x3b1   :  { %v1675_v55 = vpop.f32.mrf.mxu1  ;;  %v624_v59 = vpop.f32.mrf.mxu0 }
 0x3b2   :  { %v698_v56 = vmul.f32 0.5, %v697_v54  ;;  %v702_v60 = vadd.f32 %v1381_v58, %v624_v59  ;;  %v2819_v59 = vld [vmem:[%s3081_s1 + $0xb0] sm:$0xff] }
 0x3b4   :  { %1836 = vtanh.f32 %v698_v56  ;;  %v703_v3 = vmul.f32 0.5, %v702_v60  ;;  %v2826_v60 = vld [vmem:[%s3081_s1 + $0xa8] sm:$0xff] }
 0x3b6   :  { %1838 = vtanh.f32 %v703_v3  ;;  %v2832_v3 = vld [vmem:[%s3081_s1 + $0xb8] sm:$0xff] }
 0x3c1   :  { %v1837_v57 = vpop.eup %1836 }
 0x3c2   :  { %v700_v63 = vadd.f32 1.0, %v1837_v57  ;;  %v2838_v57 = vld [vmem:[%s3081_s1 + $0x98] sm:$0xff] }
 0x3c3   :  { %v1839_v62 = vpop.eup %1838 }
 0x3c4   :  { %v701_v49 = vmul.f32 0.5, %v700_v63  ;;  %v705_v54 = vadd.f32 1.0, %v1839_v62  ;;  %v2845_v63 = vld [vmem:[%s3081_s1 + $0x90] sm:$0xff]  ;;  %v2876_v62 = vld [vmem:[%s3081_s1 + $0x68] sm:$0xff] }
 0x3c6   :  { %v707_v48 = vmul.f32 %v701_v49, %v693_v52  ;;  %v706_v56 = vmul.f32 0.5, %v705_v54  ;;  %v2813_v52 = vld [vmem:[%s3081_s1 + $0xd0] sm:$0xff]  ;;  %v2851_v49 = vld [vmem:[%s3081_s1 + $0xa0] sm:$0xff] }
 0x3c7   :  { %v2883_v54 = vld [vmem:[%s3081_s1 + $0x60] sm:$0xff] }
 0x3c8   :  { %v708_v0 = vadd.f32 %v1382_v50, %v707_v48  ;;  %v2857_v50 = vld [vmem:[%s3081_s1 + $0x80] sm:$0xff]  ;;  %v2864_v48 = vld [vmem:[%s3081_s1 + $0x78] sm:$0xff] }
 0x3ca   :  { %1840 = vtanh.f32 %v708_v0  ;;  %v2870_v0 = vld [vmem:[%s3081_s1 + $0x88] sm:$0xff] }
 0x3d7   :  { %v1841_v55 = vpop.eup %1840 }
 0x3d8   :  { %v710_v44 = vsub.f32 %v2488_v51, %v1841_v55  ;;  %v2794_v51 = vld [vmem:[%s3081_s1 + $0xe8] sm:$0xff] }
 0x3da   :  { %v711_v61 = vmul.f32 %v710_v44, %v706_v56  ;;  %v2807_v44 = vld [vmem:[%s3081_s1 + $0xc0] sm:$0xff]  ;;  %v2895_v56 = vld [vmem:[%s3081_s1 + $0x50] sm:$0xff] }
 0x3dc   :  { %v2573_v58 = vadd.f32 %v1841_v55, %v711_v61  ;;  %v2800_v61 = vld [vmem:[%s3081_s1 + $0xc8] sm:$0xff]  ;;  %v2889_v55 = vld [vmem:[%s3081_s1 + $0x70] sm:$0xff] }
 0x3de   :  { %1383 = vst [vmem:[%s3083_s2 + $0x18] sm:$0xff] %v2573_v58  ;;  %784 = vmatmul.mubr.f32.vlgmr.msra.gmra.mxu0 %v2573_v58  ;;  %1709 = vmatmul.mubr.f32.vlgmr.msra.gmra.mxu1 %v2573_v58 }
 0x3df   :  { %883 = vmatpush1.msra.mxu0 %v1939_v1  ;;  %1712 = vmatpush3.msra.mxu1 %v1995_v11  ;;  %v3106_v1 = vld [vmem:[#allocation4_spill] sm:$0xff] }
 0x3e0   :  { %884 = vmatprep.subr.mxu0 %v1944_v2  ;;  %1713 = vmatprep.subr.mxu1 %v3097_v53  ;;  %v3107_v2 = vld [vmem:[#allocation5_spill] sm:$0xff]  ;;  %v1385_v11 = vld [vmem:[%s3082_s0 + $0x68] sm:$0xff] }
 0x3e1   :  { %885 = vmatpush1.msra.mxu0 %v1952_v4  ;;  %1714 = vmatpush3.msra.mxu1 %v2007_v13  ;;  %v2649_v4 = vld [vmem:[%s3081_s1 + $0x170] sm:$0xff] }
 0x3e2   :  { %886 = vmatprep.subr.mxu0 %v1960_v5  ;;  %1715 = vmatprep.subr.mxu1 %v3097_v53  ;;  %v1384_v5 = vld [vmem:[%s3082_s0 + $0x60] sm:$0xff] }
 0x3e3   :  { %887 = vmatpush1.msra.mxu0 %v1966_v6  ;;  %1716 = vmatpush3.msra.mxu1 %v2019_v15 }
 0x3e4   :  { %888 = vmatprep.subr.mxu0 %v1972_v7  ;;  %1717 = vmatprep.subr.mxu1 %v3097_v53 }
 0x3e5   :  { %889 = vmatpush1.msra.mxu0 %v1978_v8  ;;  %1718 = vmatpush3.msra.mxu1 %v2038_v18  ;;  %v1386_v18 = vld [vmem:[%s3082_s0 + $0x70] sm:$0xff] }
 0x3e6   :  { %890 = vmatprep.subr.mxu0 %v1984_v9  ;;  %1719 = vmatprep.subr.mxu1 %v3097_v53 }
 0x3e7   :  { %891 = vmatpush1.msra.mxu0 %v1990_v10  ;;  %1720 = vmatpush3.msra.mxu1 %v2057_v21 }
 0x3e8   :  { %892 = vmatprep.subr.mxu0 %v2001_v12  ;;  %1721 = vmatprep.subr.mxu1 %v3097_v53 }
 0x3e9   :  { %893 = vmatpush1.msra.mxu0 %v2013_v14  ;;  %1722 = vmatpush3.msra.mxu1 %v2076_v24 }
 0x3ea   :  { %894 = vmatprep.subr.mxu0 %v2025_v16  ;;  %1723 = vmatprep.subr.mxu1 %v3097_v53 }
 0x3eb   :  { %895 = vmatpush1.msra.mxu0 %v2032_v17  ;;  %1724 = vmatpush3.msra.mxu1 %v2095_v27 }
 0x3ec   :  { %896 = vmatprep.subr.mxu0 %v2044_v19  ;;  %1725 = vmatprep.subr.mxu1 %v3097_v53 }
 0x3ed   :  { %897 = vmatpush1.msra.mxu0 %v2051_v20  ;;  %1726 = vmatpush3.msra.mxu1 %v2114_v30  ;;  %v2686_v30 = vld [vmem:[%s3081_s1 + $0x158] sm:$0xff] }
 0x3ee   :  { %898 = vmatprep.subr.mxu0 %v2063_v22  ;;  %1727 = vmatprep.subr.mxu1 %v3097_v53 }
 0x3ef   :  { %899 = vmatpush1.msra.mxu0 %v2070_v23  ;;  %1728 = vmatpush3.msra.mxu1 %v2133_v33  ;;  %v2705_v33 = vld [vmem:[%s3081_s1 + $0x140] sm:$0xff] }
 0x3f0   :  { %900 = vmatprep.subr.mxu0 %v2082_v25  ;;  %1729 = vmatprep.subr.mxu1 %v3097_v53 }
 0x3f1   :  { %901 = vmatpush1.msra.mxu0 %v2089_v26  ;;  %1730 = vmatpush3.msra.mxu1 %v2152_v36  ;;  %v2724_v36 = vld [vmem:[%s3081_s1 + $0x128] sm:$0xff] }
 0x3f2   :  { %902 = vmatprep.subr.mxu0 %v2101_v28  ;;  %1731 = vmatprep.subr.mxu1 %v3097_v53  ;;  %v2674_v28 = vld [vmem:[%s3081_s1 + $0x168] sm:$0xff] }
 0x3f3   :  { %903 = vmatpush1.msra.mxu0 %v2108_v29  ;;  %1732 = vmatpush3.msra.mxu1 %v2171_v39  ;;  %v2680_v29 = vld [vmem:[%s3081_s1 + $0x178] sm:$0xff]  ;;  %v2743_v39 = vld [vmem:[%s3081_s1 + $0x110] sm:$0xff] }
 0x3f4   :  { %904 = vmatprep.subr.mxu0 %v2120_v31  ;;  %1733 = vmatprep.subr.mxu1 %v3097_v53  ;;  %v2693_v31 = vld [vmem:[%s3081_s1 + $0x150] sm:$0xff] }
 0x3f5   :  { %905 = vmatpush1.msra.mxu0 %v2127_v32  ;;  %1734 = vmatpush3.msra.mxu1 %v2190_v42  ;;  %v2699_v32 = vld [vmem:[%s3081_s1 + $0x160] sm:$0xff]  ;;  %v2762_v42 = vld [vmem:[%s3081_s1 + $0xf8] sm:$0xff] }
 0x3f6   :  { %906 = vmatprep.subr.mxu0 %v2139_v34  ;;  %1735 = vmatprep.subr.mxu1 %v3097_v53  ;;  %v2712_v34 = vld [vmem:[%s3081_s1 + $0x138] sm:$0xff] }
 0x3f7   :  { %907 = vmatpush1.msra.mxu0 %v2146_v35  ;;  %1736 = vmatpush3.msra.mxu1 %v2209_v45  ;;  %v2718_v35 = vld [vmem:[%s3081_s1 + $0x148] sm:$0xff]  ;;  %v2775_v45 = vld [vmem:[%s3081_s1 + $0x100] sm:$0xff] }
 0x3f8   :  { %908 = vmatprep.subr.mxu0 %v2158_v37  ;;  %1737 = vmatprep.subr.mxu1 %v3097_v53  ;;  %v2731_v37 = vld [vmem:[%s3081_s1 + $0x120] sm:$0xff] }
 0x3f9   :  { %909 = vmatpush1.msra.mxu0 %v2165_v38  ;;  %1738 = vmatpush3.msra.mxu1 %v2218_v46  ;;  %v2737_v38 = vld [vmem:[%s3081_s1 + $0x130] sm:$0xff]  ;;  %v2781_v46 = vld [vmem:[%s3081_s1 + $0xe0] sm:$0xff] }
 0x3fa   :  { %910 = vmatprep.subr.mxu0 %v2177_v40  ;;  %1739 = vmatprep.subr.mxu1 %v3097_v53  ;;  %v2750_v40 = vld [vmem:[%s3081_s1 + $0x108] sm:$0xff] }
 0x3fb   :  { %911 = vmatpush1.msra.mxu0 %v2184_v41  ;;  %1740 = vmatpush3.msra.mxu1 %v2227_v47  ;;  %v2756_v41 = vld [vmem:[%s3081_s1 + $0x118] sm:$0xff] }
 0x3fc   :  { %912 = vmatprep.subr.mxu0 %v2196_v43  ;;  %1741 = vmatprep.subr.mxu1 %v3097_v53  ;;  %v2769_v43 = vld [vmem:[%s3081_s1 + $0xf0] sm:$0xff]  ;;  %v2788_v47 = vld [vmem:[%s3081_s1 + $0xd8] sm:$0xff] }
 0x3fd   :  { %913 = vmatpush1.msra.mxu0 %v3106_v1  ;;  %946 = vmatprep.mubr.f32.mxu0 %v3097_v53  ;;  %v2908_v1 = vld [vmem:[%s3081_s1 + $0x58] sm:$0xff] }
 0x3fe   :  { %1742 = vmatpush3.msra.mxu1 %v3107_v2  ;;  %1743 = vmatprep.mubr.msk.f32.mxu1 %vm1915_vm0, %v3097_v53  ;;  %v2914_v2 = vld [vmem:[%s3081_s1 + $0x38] sm:$0xff] }
 0x3ff   :  { %1045 = vmatprep.subr.mxu0 %v2649_v4  ;;  %1746 = vmatprep.subr.mxu1 %v3097_v53 }
 0x49e   :  { %v785_v6 = vpop.f32.mrf.mxu0  ;;  %v856_v7 = vpop.f32.mrf.mxu1 }
 0x49f   :  { %v860_v8 = vadd.f32 %v1384_v5, %v785_v6  ;;  %v2921_v5 = vld [vmem:[%s3081_s1 + $0x30] sm:$0xff]  ;;  %v2927_v6 = vld [vmem:[%s3081_s1 + $0x40] sm:$0xff] }
 0x4a0   :  { %v1710_v9 = vpop.f32.mrf.mxu1  ;;  %v787_v12 = vpop.f32.mrf.mxu0 }
 0x4a1   :  { %v861_v10 = vmul.f32 0.5, %v860_v8  ;;  %v865_v13 = vadd.f32 %v1385_v11, %v787_v12  ;;  %v2940_v8 = vld [vmem:[%s3081_s1 + $0x18] sm:$0xff]  ;;  %v2946_v9 = vld [vmem:[%s3081_s1 + $0x28] sm:$0xff]  ;;  %v2959_v11 = vld [vmem:[%s3081_s1] sm:$0xff] }
 0x4a2   :  { %3108 = vst [vmem:[#allocation3_spill] sm:$0xff] %v2959_v11  ;;  %v2966_v12 = vld [vmem:[%s3081_s1 + $0x10] sm:$0xff] }
 0x4a3   :  { %1842 = vtanh.f32 %v861_v10  ;;  %v866_v14 = vmul.f32 0.5, %v865_v13  ;;  %v2952_v10 = vld [vmem:[%s3081_s1 + $0x8] sm:$0xff]  ;;  %3109 = vst [vmem:[#allocation4_spill] sm:$0xff] %v2966_v12  ;;  %v1388_v13 = vld [vmem:[%s3082_s0 + $0x78] sm:$0xff] }
 0x4a5   :  { %1844 = vtanh.f32 %v866_v14 }
 0x4b0   :  { %v1843_v15 = vpop.eup %1842 }
 0x4b1   :  { %v863_v16 = vadd.f32 1.0, %v1843_v15 }
 0x4b2   :  { %v1845_v21 = vpop.eup %1844 }
 0x4b3   :  { %v864_v17 = vmul.f32 0.5, %v863_v16  ;;  %v868_v22 = vadd.f32 1.0, %v1845_v21 }
 0x4b5   :  { %v870_v19 = vmul.f32 %v864_v17, %v856_v7  ;;  %v869_v24 = vmul.f32 0.5, %v868_v22  ;;  %v2933_v7 = vld [vmem:[%s3081_s1 + $0x20] sm:$0xff] }
 0x4b7   :  { %v871_v20 = vadd.f32 %v1386_v18, %v870_v19  ;;  %v1389_v19 = vld [vmem:[%s3082_s0 + $0x80] sm:$0xff] }
 0x4b9   :  { %1846 = vtanh.f32 %v871_v20 }
 0x4c6   :  { %v1847_v23 = vpop.eup %1846 }
 0x4c7   :  { %v873_v25 = vsub.f32 %v2573_v58, %v1847_v23  ;;  %v2902_v58 = vld [vmem:[%s3081_s1 + $0x48] sm:$0xff] }
 0x4c9   :  { %v874_v26 = vmul.f32 %v873_v25, %v869_v24  ;;  %v1390_v25 = vld [vmem:[%s3082_s0 + $0x88] sm:$0xff] }
 0x4cb   :  { %v2663_v27 = vadd.f32 %v1847_v23, %v874_v26 }
 0x4cd   :  { %1387 = vst [vmem:[%s3083_s2 + $0x20] sm:$0xff] %v2663_v27  ;;  %947 = vmatmul.mubr.f32.vlgmr.msra.gmra.mxu0 %v2663_v27  ;;  %1744 = vmatmul.mubr.f32.vlgmr.msra.gmra.mxu1 %v2663_v27 }
 0x4ce   :  { %1046 = vmatpush1.msra.mxu0 %v2674_v28  ;;  %1747 = vmatpush3.msra.mxu1 %v2680_v29 }
 0x4cf   :  { %1047 = vmatprep.subr.mxu0 %v2686_v30  ;;  %1748 = vmatprep.subr.mxu1 %v3097_v53 }
 0x4d0   :  { %1048 = vmatpush1.msra.mxu0 %v2693_v31  ;;  %1749 = vmatpush3.msra.mxu1 %v2699_v32 }
 0x4d1   :  { %1049 = vmatprep.subr.mxu0 %v2705_v33  ;;  %1750 = vmatprep.subr.mxu1 %v3097_v53 }
 0x4d2   :  { %1050 = vmatpush1.msra.mxu0 %v2712_v34  ;;  %1751 = vmatpush3.msra.mxu1 %v2718_v35 }
 0x4d3   :  { %1051 = vmatprep.subr.mxu0 %v2724_v36  ;;  %1752 = vmatprep.subr.mxu1 %v3097_v53 }
 0x4d4   :  { %1052 = vmatpush1.msra.mxu0 %v2731_v37  ;;  %1753 = vmatpush3.msra.mxu1 %v2737_v38 }
 0x4d5   :  { %1053 = vmatprep.subr.mxu0 %v2743_v39  ;;  %1754 = vmatprep.subr.mxu1 %v3097_v53 }
 0x4d6   :  { %1054 = vmatpush1.msra.mxu0 %v2750_v40  ;;  %1755 = vmatpush3.msra.mxu1 %v2756_v41 }
 0x4d7   :  { %1055 = vmatprep.subr.mxu0 %v2762_v42  ;;  %1756 = vmatprep.subr.mxu1 %v3097_v53 }
 0x4d8   :  { %1056 = vmatpush1.msra.mxu0 %v2769_v43  ;;  %1757 = vmatpush3.msra.mxu1 %v2775_v45 }
 0x4d9   :  { %1057 = vmatprep.subr.mxu0 %v2781_v46  ;;  %1758 = vmatprep.subr.mxu1 %v3097_v53 }
 0x4da   :  { %1058 = vmatpush1.msra.mxu0 %v2788_v47  ;;  %1759 = vmatpush3.msra.mxu1 %v2794_v51 }
 0x4db   :  { %1059 = vmatprep.subr.mxu0 %v2800_v61  ;;  %1760 = vmatprep.subr.mxu1 %v3097_v53 }
 0x4dc   :  { %1060 = vmatpush1.msra.mxu0 %v2807_v44  ;;  %1761 = vmatpush3.msra.mxu1 %v2813_v52 }
 0x4dd   :  { %1061 = vmatprep.subr.mxu0 %v2819_v59  ;;  %1762 = vmatprep.subr.mxu1 %v3097_v53 }
 0x4de   :  { %1062 = vmatpush1.msra.mxu0 %v2826_v60  ;;  %1763 = vmatpush3.msra.mxu1 %v2832_v3 }
 0x4df   :  { %1063 = vmatprep.subr.mxu0 %v2838_v57  ;;  %1764 = vmatprep.subr.mxu1 %v3097_v53 }
 0x4e0   :  { %1064 = vmatpush1.msra.mxu0 %v2845_v63  ;;  %1765 = vmatpush3.msra.mxu1 %v2851_v49 }
 0x4e1   :  { %1065 = vmatprep.subr.mxu0 %v2857_v50  ;;  %1766 = vmatprep.subr.mxu1 %v3097_v53 }
 0x4e2   :  { %1066 = vmatpush1.msra.mxu0 %v2864_v48  ;;  %1767 = vmatpush3.msra.mxu1 %v2870_v0 }
 0x4e3   :  { %1067 = vmatprep.subr.mxu0 %v2876_v62  ;;  %1768 = vmatprep.subr.mxu1 %v3097_v53 }
 0x4e4   :  { %1068 = vmatpush1.msra.mxu0 %v2883_v54  ;;  %1769 = vmatpush3.msra.mxu1 %v2889_v55 }
 0x4e5   :  { %1069 = vmatprep.subr.mxu0 %v2895_v56  ;;  %1770 = vmatprep.subr.mxu1 %v3097_v53 }
 0x4e6   :  { %1070 = vmatpush1.msra.mxu0 %v2902_v58  ;;  %1771 = vmatpush3.msra.mxu1 %v2908_v1 }
 0x4e7   :  { %1071 = vmatprep.subr.mxu0 %v2914_v2  ;;  %1772 = vmatprep.subr.mxu1 %v3097_v53 }
 0x4e8   :  { %1072 = vmatpush1.msra.mxu0 %v2921_v5  ;;  %1773 = vmatpush3.msra.mxu1 %v2927_v6 }
 0x4e9   :  { %1073 = vmatprep.subr.mxu0 %v2933_v7  ;;  %1774 = vmatprep.subr.mxu1 %v3097_v53 }
 0x4ea   :  { %1074 = vmatpush1.msra.mxu0 %v2940_v8  ;;  %1775 = vmatpush3.msra.mxu1 %v2946_v9 }
 0x4eb   :  { %1075 = vmatprep.subr.mxu0 %v2952_v10  ;;  %1776 = vmatprep.subr.mxu1 %v3097_v53 }
 0x4ec   :  { %1076 = vmatpush1.msra.mxu0 %v2959_v11  ;;  %1109 = vmatprep.mubr.f32.mxu0 %v3097_v53 }
 0x4ed   :  { %1777 = vmatpush3.msra.mxu1 %v2966_v12  ;;  %1778 = vmatprep.mubr.msk.f32.mxu1 %vm1915_vm0, %v3097_v53 }
 0x4ee   :  { %1208 = vmatprep.subr.mxu0 %v2649_v4  ;;  %1781 = vmatprep.subr.mxu1 %v3097_v53 }
 0x58d   :  { %v948_v14 = vpop.f32.mrf.mxu0  ;;  %v1019_v15 = vpop.f32.mrf.mxu1 }
 0x58e   :  { %v1023_v16 = vadd.f32 %v1388_v13, %v948_v14 }
 0x58f   :  { %v1745_v17 = vpop.f32.mrf.mxu1  ;;  %v950_v20 = vpop.f32.mrf.mxu0 }
 0x590   :  { %v1024_v18 = vmul.f32 0.5, %v1023_v16  ;;  %v1028_v21 = vadd.f32 %v1389_v19, %v950_v20 }
 0x592   :  { %1848 = vtanh.f32 %v1024_v18  ;;  %v1029_v22 = vmul.f32 0.5, %v1028_v21 }
 0x594   :  { %1850 = vtanh.f32 %v1029_v22 }
 0x59f   :  { %v1849_v4 = vpop.eup %1848 }
 0x5a0   :  { %v1026_v23 = vadd.f32 1.0, %v1849_v4 }
 0x5a1   :  { %v1851_v14 = vpop.eup %1850 }
 0x5a2   :  { %v1027_v24 = vmul.f32 0.5, %v1026_v23  ;;  %v1031_v16 = vadd.f32 1.0, %v1851_v14 }
 0x5a4   :  { %v1033_v26 = vmul.f32 %v1027_v24, %v1019_v15  ;;  %v1032_v18 = vmul.f32 0.5, %v1031_v16 }
 0x5a6   :  { %v1034_v13 = vadd.f32 %v1390_v25, %v1033_v26 }
 0x5a8   :  { %1852 = vtanh.f32 %v1034_v13 }
 0x5b5   :  { %v1853_v17 = vpop.eup %1852 }
 0x5b6   :  { %v1036_v12 = vsub.f32 %v2663_v27, %v1853_v17  ;;  %v3110_v27 = vld [vmem:[#allocation3_spill] sm:$0xff] }
 0x5b8   :  { %v1037_v11 = vmul.f32 %v1036_v12, %v1032_v18 }
 0x5ba   :  { %v2983_v19 = vadd.f32 %v1853_v17, %v1037_v11 }
 0x5bc   :  { %1391 = vst [vmem:[%s3083_s2 + $0x28] sm:$0xff] %v2983_v19  ;;  %1110 = vmatmul.mubr.f32.vlgmr.msra.gmra.mxu0 %v2983_v19  ;;  %1779 = vmatmul.mubr.f32.vlgmr.msra.gmra.mxu1 %v2983_v19 }
 0x5bd   :  { %1209 = vmatpush1.msra.mxu0 %v2674_v28  ;;  %1782 = vmatpush3.msra.mxu1 %v2680_v29  ;;  %v3111_v28 = vld [vmem:[#allocation4_spill] sm:$0xff]  ;;  %v1392_v29 = vld [vmem:[%s3082_s0 + $0x90] sm:$0xff] }
 0x5be   :  { %1210 = vmatprep.subr.mxu0 %v2686_v30  ;;  %1783 = vmatprep.subr.mxu1 %v3097_v53 }
 0x5bf   :  { %1211 = vmatpush1.msra.mxu0 %v2693_v31  ;;  %1784 = vmatpush3.msra.mxu1 %v2699_v32 }
 0x5c0   :  { %1212 = vmatprep.subr.mxu0 %v2705_v33  ;;  %1785 = vmatprep.subr.mxu1 %v3097_v53 }
 0x5c1   :  { %1213 = vmatpush1.msra.mxu0 %v2712_v34  ;;  %1786 = vmatpush3.msra.mxu1 %v2718_v35  ;;  %v1393_v35 = vld [vmem:[%s3082_s0 + $0x98] sm:$0xff] }
 0x5c2   :  { %1214 = vmatprep.subr.mxu0 %v2724_v36  ;;  %1787 = vmatprep.subr.mxu1 %v3097_v53 }
 0x5c3   :  { %1215 = vmatpush1.msra.mxu0 %v2731_v37  ;;  %1788 = vmatpush3.msra.mxu1 %v2737_v38 }
 0x5c4   :  { %1216 = vmatprep.subr.mxu0 %v2743_v39  ;;  %1789 = vmatprep.subr.mxu1 %v3097_v53 }
 0x5c5   :  { %1217 = vmatpush1.msra.mxu0 %v2750_v40  ;;  %1790 = vmatpush3.msra.mxu1 %v2756_v41  ;;  %v1394_v41 = vld [vmem:[%s3082_s0 + $0xa0] sm:$0xff] }
 0x5c6   :  { %1218 = vmatprep.subr.mxu0 %v2762_v42  ;;  %1791 = vmatprep.subr.mxu1 %v3097_v53 }
 0x5c7   :  { %1219 = vmatpush1.msra.mxu0 %v2769_v43  ;;  %1792 = vmatpush3.msra.mxu1 %v2775_v45 }
 0x5c8   :  { %1220 = vmatprep.subr.mxu0 %v2781_v46  ;;  %1793 = vmatprep.subr.mxu1 %v3097_v53 }
 0x5c9   :  { %1221 = vmatpush1.msra.mxu0 %v2788_v47  ;;  %1794 = vmatpush3.msra.mxu1 %v2794_v51 }
 0x5ca   :  { %1222 = vmatprep.subr.mxu0 %v2800_v61  ;;  %1795 = vmatprep.subr.mxu1 %v3097_v53 }
 0x5cb   :  { %1223 = vmatpush1.msra.mxu0 %v2807_v44  ;;  %1796 = vmatpush3.msra.mxu1 %v2813_v52 }
 0x5cc   :  { %1224 = vmatprep.subr.mxu0 %v2819_v59  ;;  %1797 = vmatprep.subr.mxu1 %v3097_v53  ;;  %v1396_v59 = vld [vmem:[%s3082_s0 + $0xa8] sm:$0xff] }
 0x5cd   :  { %1225 = vmatpush1.msra.mxu0 %v2826_v60  ;;  %1798 = vmatpush3.msra.mxu1 %v2832_v3 }
 0x5ce   :  { %1226 = vmatprep.subr.mxu0 %v2838_v57  ;;  %1799 = vmatprep.subr.mxu1 %v3097_v53 }
 0x5cf   :  { %1227 = vmatpush1.msra.mxu0 %v2845_v63  ;;  %1800 = vmatpush3.msra.mxu1 %v2851_v49 }
 0x5d0   :  { %1228 = vmatprep.subr.mxu0 %v2857_v50  ;;  %1801 = vmatprep.subr.mxu1 %v3097_v53  ;;  %v1397_v50 = vld [vmem:[%s3082_s0 + $0xb0] sm:$0xff] }
 0x5d1   :  { %1229 = vmatpush1.msra.mxu0 %v2864_v48  ;;  %1802 = vmatpush3.msra.mxu1 %v2870_v0 }
 0x5d2   :  { %1230 = vmatprep.subr.mxu0 %v2876_v62  ;;  %1803 = vmatprep.subr.mxu1 %v3097_v53 }
 0x5d3   :  { %1231 = vmatpush1.msra.mxu0 %v2883_v54  ;;  %1804 = vmatpush3.msra.mxu1 %v2889_v55 }
 0x5d4   :  { %1232 = vmatprep.subr.mxu0 %v2895_v56  ;;  %1805 = vmatprep.subr.mxu1 %v3097_v53 }
 0x5d5   :  { %1233 = vmatpush1.msra.mxu0 %v2902_v58  ;;  %1806 = vmatpush3.msra.mxu1 %v2908_v1  ;;  %v1398_v58 = vld [vmem:[%s3082_s0 + $0xb8] sm:$0xff] }
 0x5d6   :  { %1234 = vmatprep.subr.mxu0 %v2914_v2  ;;  %1807 = vmatprep.subr.mxu1 %v3097_v53 }
 0x5d7   :  { %1235 = vmatpush1.msra.mxu0 %v2921_v5  ;;  %1808 = vmatpush3.msra.mxu1 %v2927_v6 }
 0x5d8   :  { %1236 = vmatprep.subr.mxu0 %v2933_v7  ;;  %1809 = vmatprep.subr.mxu1 %v3097_v53 }
 0x5d9   :  { %1237 = vmatpush1.msra.mxu0 %v2940_v8  ;;  %1810 = vmatpush3.msra.mxu1 %v2946_v9 }
 0x5da   :  { %1238 = vmatprep.subr.mxu0 %v2952_v10  ;;  %1811 = vmatprep.subr.mxu1 %v3097_v53 }
 0x5db   :  { %1239 = vmatpush1.msra.mxu0 %v3110_v27  ;;  %1272 = vmatprep.mubr.f32.mxu0 %v3097_v53 }
 0x5dc   :  { %1812 = vmatpush3.msra.mxu1 %v3111_v28  ;;  %1813 = vmatprep.mubr.msk.f32.mxu1 %vm1915_vm0, %v3097_v53 }
 0x67c   :  { %v1111_v30 = vpop.f32.mrf.mxu0  ;;  %v1182_v31 = vpop.f32.mrf.mxu1 }
 0x67d   :  { %v1186_v32 = vadd.f32 %v1392_v29, %v1111_v30 }
 0x67e   :  { %v1780_v33 = vpop.f32.mrf.mxu1  ;;  %v1113_v36 = vpop.f32.mrf.mxu0 }
 0x67f   :  { %v1187_v34 = vmul.f32 0.5, %v1186_v32  ;;  %v1191_v37 = vadd.f32 %v1393_v35, %v1113_v36 }
 0x681   :  { %1854 = vtanh.f32 %v1187_v34  ;;  %v1192_v38 = vmul.f32 0.5, %v1191_v37 }
 0x683   :  { %1856 = vtanh.f32 %v1192_v38 }
 0x68e   :  { %v1855_v39 = vpop.eup %1854 }
 0x68f   :  { %v1189_v40 = vadd.f32 1.0, %v1855_v39 }
 0x690   :  { %v1857_v45 = vpop.eup %1856 }
 0x691   :  { %v1190_v53 = vmul.f32 0.5, %v1189_v40  ;;  %v1194_v46 = vadd.f32 1.0, %v1857_v45 }
 0x693   :  { %v1196_v42 = vmul.f32 %v1190_v53, %v1182_v31  ;;  %v1195_v51 = vmul.f32 0.5, %v1194_v46 }
 0x695   :  { %v1197_v43 = vadd.f32 %v1394_v41, %v1196_v42 }
 0x697   :  { %1858 = vtanh.f32 %v1197_v43 }
 0x6a4   :  { %v1859_v47 = vpop.eup %1858 }
 0x6a5   :  { %v1199_v61 = vsub.f32 %v2983_v19, %v1859_v47 }
 0x6a7   :  { %v1200_v44 = vmul.f32 %v1199_v61, %v1195_v51 }
 0x6a9   :  { %v1201_v52 = vadd.f32 %v1859_v47, %v1200_v44 }
 0x6ab   :  { %1395 = vst [vmem:[%s3083_s2 + $0x30] sm:$0xff] %v1201_v52  ;;  %1273 = vmatmul.mubr.f32.vlgmr.msra.gmra.mxu0 %v1201_v52  ;;  %1814 = vmatmul.mubr.f32.vlgmr.msra.gmra.mxu1 %v1201_v52 }
 0x76b   :  { %v1274_v60 = vpop.f32.mrf.mxu0  ;;  %v1345_v3 = vpop.f32.mrf.mxu1 }
 0x76c   :  { %v1349_v57 = vadd.f32 %v1396_v59, %v1274_v60 }
 0x76d   :  { %v1815_v63 = vpop.f32.mrf.mxu1  ;;  %v1276_v48 = vpop.f32.mrf.mxu0 }
 0x76e   :  { %v1350_v49 = vmul.f32 0.5, %v1349_v57  ;;  %v1354_v0 = vadd.f32 %v1397_v50, %v1276_v48 }
 0x770   :  { %1860 = vtanh.f32 %v1350_v49  ;;  %v1355_v62 = vmul.f32 0.5, %v1354_v0 }
 0x772   :  { %1862 = vtanh.f32 %v1355_v62 }
 0x77d   :  { %v1861_v54 = vpop.eup %1860 }
 0x77e   :  { %v1352_v55 = vadd.f32 1.0, %v1861_v54 }
 0x77f   :  { %v1863_v5 = vpop.eup %1862 }
 0x780   :  { %v1353_v56 = vmul.f32 0.5, %v1352_v55  ;;  %v1357_v6 = vadd.f32 1.0, %v1863_v5 }
 0x782   :  { %v1359_v1 = vmul.f32 %v1353_v56, %v1345_v3  ;;  %v1358_v8 = vmul.f32 0.5, %v1357_v6 }
 0x784   :  { %v1360_v2 = vadd.f32 %v1398_v58, %v1359_v1 }
 0x786   :  { %1864 = vtanh.f32 %v1360_v2 }
 0x793   :  { %v1865_v7 = vpop.eup %1864 }
 0x794   :  { %v1362_v9 = vsub.f32 %v1201_v52, %v1865_v7 }
 0x796   :  { %v1363_v10 = vmul.f32 %v1362_v9, %v1358_v8 }
 0x798   :  { %v1364_v11 = vadd.f32 %v1865_v7, %v1363_v10 }
 0x79a   :  { %1399 = vst [vmem:[%s3083_s2 + $0x38] sm:$0xff] %v1364_v11 }

</bundles_post_ra>
